<compile_context>
chip_gen: v5e
topology: v5e:2x2
jax: 0.10.0
libtpu: 0.0.40
codegen_flags: <defaults>
</compile_context>

<pallas_src>
import jax
import jax.numpy as jnp
from jax.experimental import pallas as pl
from jax.experimental.pallas import tpu as pltpu


def _mul_kernel(scale_ref, x_ref, o_ref):
    # scale_ref: (TC, 1), x_ref: (TC, HW) -> lane-broadcast multiply on the VPU
    o_ref[...] = scale_ref[...] * x_ref[...]


def channel_scale_mul(scale, x):
    """scale: (N, C, 1, 1), x: (N, C, H, W) -> (N, C, H, W), elementwise mul."""
    N, C, H, W = x.shape
    assert scale.shape == (N, C, 1, 1)
    rows = N * C
    hw = H * W

    x2 = x.reshape(rows, hw)
    s2 = scale.reshape(rows, 1)

    # Single block by default (v5e/v6e: one TensorCore, one grid step).
    # On v7x (2 TensorCores per chip) split 2-way so the megacore shards the
    # halves; each half must keep sublane alignment (divisible by 8).
    n_blocks = 1
    try:
        kind = jax.devices()[0].device_kind.lower()
        if "v7" in kind and rows % 2 == 0 and (rows // 2) % 8 == 0:
            n_blocks = 2
    except Exception:
        pass
    tc = rows // n_blocks

    itemsize = jnp.dtype(x.dtype).itemsize
    cost = pl.CostEstimate(
        flops=rows * hw,
        transcendentals=0,
        bytes_accessed=(2 * rows * hw + rows) * itemsize,
    )

    out = pl.pallas_call(
        _mul_kernel,
        out_shape=jax.ShapeDtypeStruct((rows, hw), x.dtype),
        grid_spec=pltpu.PrefetchScalarGridSpec(
            num_scalar_prefetch=0,
            grid=(n_blocks,),
            in_specs=[
                pl.BlockSpec((tc, 1), lambda i: (i, 0)),    # per-channel scale
                pl.BlockSpec((tc, hw), lambda i: (i, 0)),   # activations
            ],
            out_specs=pl.BlockSpec((tc, hw), lambda i: (i, 0)),
        ),
        compiler_params=pltpu.CompilerParams(
            dimension_semantics=("parallel",),
        ),
        cost_estimate=cost,
    )(s2, x2)

    return out.reshape(N, C, H, W)


if __name__ == "__main__":
    key = jax.random.PRNGKey(0)
    k1, k2 = jax.random.split(key)

    # shapes implied by the module's forward
    x374 = jax.random.normal(k1, (1, 1056, 14, 14), dtype=jnp.float32)
    x379 = jax.random.normal(k2, (1, 1056, 1, 1), dtype=jnp.float32)

    out = channel_scale_mul(x379, x374)
    out = jax.block_until_ready(out)

    ref = x379 * x374
    assert out.shape == ref.shape == (1, 1056, 14, 14)
    assert jnp.allclose(out, ref, atol=1e-6, rtol=1e-6)

    print("KERNEL_OK")
</pallas_src>

<mosaic_0001>
module attributes {stable_mosaic.version = 11 : i64} {
  func.func @_mul_kernel(%arg0: i32, %arg1: memref<1056x1xf32, #tpu.memory_space<vmem>>, %arg2: memref<1056x196xf32, #tpu.memory_space<vmem>>, %arg3: memref<1056x196xf32, #tpu.memory_space<vmem>>) attributes {dimension_semantics = [#tpu.dimension_semantics<parallel>], iteration_bounds = array<i64: 1>, scalar_prefetch = 0 : i64, scratch_operands = 0 : i64, tpu.core_type = #tpu.core_type<tc>, window_params = [{transform_indices = @transform_0, window_bounds = array<i64: 1056, 1>}, {transform_indices = @transform_1, window_bounds = array<i64: 1056, 196>}, {transform_indices = @transform_2, window_bounds = array<i64: 1056, 196>}]} {
    %c0 = arith.constant 0 : index
    %c0_0 = arith.constant 0 : index
    %0 = vector.load %arg1[%c0, %c0_0] : memref<1056x1xf32, #tpu.memory_space<vmem>>, vector<1056x1xf32>
    %c0_1 = arith.constant 0 : index
    %c0_2 = arith.constant 0 : index
    %1 = vector.load %arg2[%c0_1, %c0_2] : memref<1056x196xf32, #tpu.memory_space<vmem>>, vector<1056x196xf32>
    %2 = vector.broadcast %0 : vector<1056x1xf32> to vector<1056x196xf32>
    %3 = arith.mulf %2, %1 : vector<1056x196xf32>
    %c0_3 = arith.constant 0 : index
    %c0_4 = arith.constant 0 : index
    %4 = vector.load %arg3[%c0_3, %c0_4] : memref<1056x196xf32, #tpu.memory_space<vmem>>, vector<1056x196xf32>
    tpu.vector_store %arg3[%c0_3, %c0_4], %3 {strides = array<i32>} : memref<1056x196xf32, #tpu.memory_space<vmem>>, vector<1056x196xf32>,
    return
  }
  func.func @transform_0(%arg0: i32) -> (i32, i32) {
    %c0_i32 = arith.constant 0 : i32
    %c0_i32_0 = arith.constant 0 : i32
    return %arg0, %c0_i32 : i32, i32
  }
  func.func @transform_1(%arg0: i32) -> (i32, i32) {
    %c0_i32 = arith.constant 0 : i32
    %c0_i32_0 = arith.constant 0 : i32
    return %arg0, %c0_i32 : i32, i32
  }
  func.func @transform_2(%arg0: i32) -> (i32, i32) {
    %c0_i32 = arith.constant 0 : i32
    %c0_i32_0 = arith.constant 0 : i32
    return %arg0, %c0_i32 : i32, i32
  }
}

</mosaic_0001>

<bundles_post_ra>
// kernel: tpu_custom_call.1
= control target key start
LH: loop header
LB: loop body
LE: loop exit
PB: predicated region body
PF: predicated region fallthrough
CT: control target
= control target key end

     0   :  { %v1604_v0 = vmov 0   ;;  %vm1332_vm0 = vcmask 556032   ;;  %s3732_s0 = inlined_call_operand.vmem [shape: f32[1056,1], index: 0, kind: input, shape index: {}]   ;;  %s3733_s1 = inlined_call_operand.vmem [shape: f32[1056,196], index: 1, kind: input, shape index: {}]   ;;  %s3734_s2 = inlined_call_operand.vmem [shape: f32[1056,196], index: 2, kind: output, shape index: {}]  }
   0x1   :  { %1603 = vset.pattern.permute.xlu2 %v1604_v0  ;;  %1602 = vset.pattern.permute.xlu1 %v1604_v0  ;;  %v15_v1 = vld [vmem:[%s3732_s0 + $0x20] sm:$0xff]  ;;  %v13_v2 = vld [vmem:[%s3732_s0 + $0x10] sm:$0xff]  ;;  %v16_v4 = vld [vmem:[%s3732_s0 + $0x28] sm:$0xff] }
   0x2   :  { %v11_v3 = vld [vmem:[%s3732_s0] sm:$0xff]  ;;  %1601 = vset.pattern.permute.xlu0 %v1604_v0  ;;  %429 = vperm.xlu2 %1603, %v15_v1   ;;  %v14_v5 = vld [vmem:[%s3732_s0 + $0x18] sm:$0xff]  ;;  %v12_v6 = vld [vmem:[%s3732_s0 + $0x8] sm:$0xff] }
   0x3   :  { %419 = vperm.xlu1 %1602, %v13_v2   ;;  %409 = vperm.xlu0 %1601, %v11_v3   ;;  %v19_v7 = vld [vmem:[%s3732_s0 + $0x40] sm:$0xff]  ;;  %v18_v8 = vld [vmem:[%s3732_s0 + $0x38] sm:$0xff]  ;;  %v17_v9 = vld [vmem:[%s3732_s0 + $0x30] sm:$0xff] }
   0x4   :  { %v22_v10 = vld [vmem:[%s3732_s0 + $0x58] sm:$0xff]  ;;  %v21_v11 = vld [vmem:[%s3732_s0 + $0x50] sm:$0xff]  ;;  %v20_v12 = vld [vmem:[%s3732_s0 + $0x48] sm:$0xff] }
   0x5   :  { %v25_v13 = vld [vmem:[%s3732_s0 + $0x70] sm:$0xff]  ;;  %v24_v14 = vld [vmem:[%s3732_s0 + $0x68] sm:$0xff]  ;;  %v23_v15 = vld [vmem:[%s3732_s0 + $0x60] sm:$0xff] }
   0x6   :  { %v28_v16 = vld [vmem:[%s3732_s0 + $0x88] sm:$0xff]  ;;  %v27_v17 = vld [vmem:[%s3732_s0 + $0x80] sm:$0xff]  ;;  %v26_v18 = vld [vmem:[%s3732_s0 + $0x78] sm:$0xff] }
   0x7   :  { %v31_v19 = vld [vmem:[%s3732_s0 + $0xa0] sm:$0xff]  ;;  %v30_v20 = vld [vmem:[%s3732_s0 + $0x98] sm:$0xff]  ;;  %v29_v21 = vld [vmem:[%s3732_s0 + $0x90] sm:$0xff] }
   0x8   :  { %v34_v22 = vld [vmem:[%s3732_s0 + $0xb8] sm:$0xff]  ;;  %v33_v23 = vld [vmem:[%s3732_s0 + $0xb0] sm:$0xff]  ;;  %v32_v24 = vld [vmem:[%s3732_s0 + $0xa8] sm:$0xff] }
   0x9   :  { %v37_v25 = vld [vmem:[%s3732_s0 + $0xd0] sm:$0xff]  ;;  %v36_v26 = vld [vmem:[%s3732_s0 + $0xc8] sm:$0xff]  ;;  %v35_v27 = vld [vmem:[%s3732_s0 + $0xc0] sm:$0xff] }
   0xa   :  { %434 = vperm.xlu2 %1603, %v16_v4   ;;  %v40_v28 = vld [vmem:[%s3732_s0 + $0xe8] sm:$0xff]  ;;  %v39_v29 = vld [vmem:[%s3732_s0 + $0xe0] sm:$0xff]  ;;  %v38_v30 = vld [vmem:[%s3732_s0 + $0xd8] sm:$0xff] }
   0xb   :  { %424 = vperm.xlu1 %1602, %v14_v5   ;;  %414 = vperm.xlu0 %1601, %v12_v6   ;;  %v43_v31 = vld [vmem:[%s3732_s0 + $0x100] sm:$0xff]  ;;  %v42_v32 = vld [vmem:[%s3732_s0 + $0xf8] sm:$0xff]  ;;  %v41_v33 = vld [vmem:[%s3732_s0 + $0xf0] sm:$0xff] }
   0xc   :  { %v46_v34 = vld [vmem:[%s3732_s0 + $0x118] sm:$0xff]  ;;  %v45_v35 = vld [vmem:[%s3732_s0 + $0x110] sm:$0xff]  ;;  %v44_v36 = vld [vmem:[%s3732_s0 + $0x108] sm:$0xff] }
   0xd   :  { %v151_v37 = vld [vmem:[%s3733_s1 + $0x40] sm:$0xff]  ;;  %v152_v38 = vld [vmem:[%s3733_s1 + $0x48] sm:$0xff]  ;;  %v49_v42 = vld [vmem:[%s3732_s0 + $0x130] sm:$0xff] }
   0xe   :  { %v48_v43 = vld [vmem:[%s3732_s0 + $0x128] sm:$0xff]  ;;  %v47_v44 = vld [vmem:[%s3732_s0 + $0x120] sm:$0xff]  ;;  %v153_v45 = vld [vmem:[%s3733_s1 + $0x50] sm:$0xff] }
   0xf   :  { %v154_v46 = vld [vmem:[%s3733_s1 + $0x58] sm:$0xff]  ;;  %v52_v50 = vld [vmem:[%s3732_s0 + $0x148] sm:$0xff]  ;;  %v51_v51 = vld [vmem:[%s3732_s0 + $0x140] sm:$0xff] }
  0x10   :  { %v50_v52 = vld [vmem:[%s3732_s0 + $0x138] sm:$0xff]  ;;  %v159_v53 = vld [vmem:[%s3733_s1 + $0x80] sm:$0xff]  ;;  %v160_v54 = vld [vmem:[%s3733_s1 + $0x88] sm:$0xff] }
  0x11   :  { %v55_v58 = vld [vmem:[%s3732_s0 + $0x160] sm:$0xff]  ;;  %v54_v59 = vld [vmem:[%s3732_s0 + $0x158] sm:$0xff]  ;;  %v53_v60 = vld [vmem:[%s3732_s0 + $0x150] sm:$0xff] }
  0x12   :  { %449 = vperm.xlu2 %1603, %v19_v7   ;;  %v165_v61 = vld [vmem:[%s3733_s1 + $0xb0] sm:$0xff]  ;;  %v166_v62 = vld [vmem:[%s3733_s1 + $0xb8] sm:$0xff]  ;;  %v147_v63 = vld [vmem:[%s3733_s1 + $0x20] sm:$0xff] }
  0x13   :  { %444 = vperm.xlu1 %1602, %v18_v8   ;;  %439 = vperm.xlu0 %1601, %v17_v9   ;;  %v148_v0 = vld [vmem:[%s3733_s1 + $0x28] sm:$0xff]  ;;  %v143_v2 = vld [vmem:[%s3733_s1] sm:$0xff] }
  0x14   :  { %v144_v6 = vld [vmem:[%s3733_s1 + $0x8] sm:$0xff] }
  0x1a   :  { %464 = vperm.xlu2 %1603, %v22_v10  }
  0x1b   :  { %459 = vperm.xlu1 %1602, %v21_v11   ;;  %454 = vperm.xlu0 %1601, %v20_v12   ;;  %v58_v11 = vld [vmem:[%s3732_s0 + $0x178] sm:$0xff] }
  0x22   :  { %479 = vperm.xlu2 %1603, %v25_v13   ;;  %v57_v13 = vld [vmem:[%s3732_s0 + $0x170] sm:$0xff] }
  0x23   :  { %474 = vperm.xlu1 %1602, %v24_v14   ;;  %469 = vperm.xlu0 %1601, %v23_v15   ;;  %v56_v14 = vld [vmem:[%s3732_s0 + $0x168] sm:$0xff]  ;;  %v171_v15 = vld [vmem:[%s3733_s1 + $0xe0] sm:$0xff] }
  0x2a   :  { %494 = vperm.xlu2 %1603, %v28_v16   ;;  %v172_v16 = vld [vmem:[%s3733_s1 + $0xe8] sm:$0xff] }
  0x2b   :  { %489 = vperm.xlu1 %1602, %v27_v17   ;;  %484 = vperm.xlu0 %1601, %v26_v18   ;;  %v149_v17 = vld [vmem:[%s3733_s1 + $0x30] sm:$0xff]  ;;  %v150_v18 = vld [vmem:[%s3733_s1 + $0x38] sm:$0xff] }
  0x32   :  { %509 = vperm.xlu2 %1603, %v31_v19  }
  0x33   :  { %504 = vperm.xlu1 %1602, %v30_v20   ;;  %499 = vperm.xlu0 %1601, %v29_v21   ;;  %v145_v20 = vld [vmem:[%s3733_s1 + $0x10] sm:$0xff] }
  0x3a   :  { %524 = vperm.xlu2 %1603, %v34_v22  }
  0x3b   :  { %519 = vperm.xlu1 %1602, %v33_v23   ;;  %514 = vperm.xlu0 %1601, %v32_v24   ;;  %v146_v24 = vld [vmem:[%s3733_s1 + $0x18] sm:$0xff] }
  0x42   :  { %539 = vperm.xlu2 %1603, %v37_v25  }
  0x43   :  { %534 = vperm.xlu1 %1602, %v36_v26   ;;  %529 = vperm.xlu0 %1601, %v35_v27  }
  0x4a   :  { %554 = vperm.xlu2 %1603, %v40_v28  }
  0x4b   :  { %549 = vperm.xlu1 %1602, %v39_v29   ;;  %544 = vperm.xlu0 %1601, %v38_v30   ;;  %v61_v29 = vld [vmem:[%s3732_s0 + $0x190] sm:$0xff] }
  0x52   :  { %569 = vperm.xlu2 %1603, %v43_v31   ;;  %v60_v31 = vld [vmem:[%s3732_s0 + $0x188] sm:$0xff] }
  0x53   :  { %564 = vperm.xlu1 %1602, %v42_v32   ;;  %559 = vperm.xlu0 %1601, %v41_v33   ;;  %v59_v32 = vld [vmem:[%s3732_s0 + $0x180] sm:$0xff]  ;;  %v177_v33 = vld [vmem:[%s3733_s1 + $0x110] sm:$0xff] }
  0x5a   :  { %584 = vperm.xlu2 %1603, %v46_v34   ;;  %v178_v34 = vld [vmem:[%s3733_s1 + $0x118] sm:$0xff] }
  0x5b   :  { %579 = vperm.xlu1 %1602, %v45_v35   ;;  %574 = vperm.xlu0 %1601, %v44_v36   ;;  %v157_v35 = vld [vmem:[%s3733_s1 + $0x70] sm:$0xff]  ;;  %v158_v36 = vld [vmem:[%s3733_s1 + $0x78] sm:$0xff] }
  0x5c   :  { %v430_v39 = vpop.permute.xlu2 %429 }
  0x5d   :  { %v1075_v40 = vmul.f32 %v430_v39, %v151_v37  ;;  %v1076_v41 = vmul.f32 %v430_v39, %v152_v38  ;;  %v155_v38 = vld [vmem:[%s3733_s1 + $0x60] sm:$0xff] }
  0x5f   :  { %1340 = vst [vmem:[%s3734_s2 + $0x40] sm:$0xff] %v1075_v40 }
  0x60   :  { %1341 = vst.msk [vmem:[%s3734_s2 + $0x48] sm:$0xff] %vm1332_vm0, %v1076_v41 }
  0x62   :  { %599 = vperm.xlu2 %1603, %v49_v42   ;;  %v156_v42 = vld [vmem:[%s3733_s1 + $0x68] sm:$0xff] }
  0x63   :  { %594 = vperm.xlu1 %1602, %v48_v43   ;;  %589 = vperm.xlu0 %1601, %v47_v44  }
  0x64   :  { %v435_v47 = vpop.permute.xlu2 %434 }
  0x65   :  { %v1077_v48 = vmul.f32 %v435_v47, %v153_v45  ;;  %v1078_v49 = vmul.f32 %v435_v47, %v154_v46  ;;  %v64_v47 = vld [vmem:[%s3732_s0 + $0x1a8] sm:$0xff] }
  0x67   :  { %1342 = vst [vmem:[%s3734_s2 + $0x50] sm:$0xff] %v1077_v48 }
  0x68   :  { %1343 = vst.msk [vmem:[%s3734_s2 + $0x58] sm:$0xff] %vm1332_vm0, %v1078_v49  ;;  %v63_v49 = vld [vmem:[%s3732_s0 + $0x1a0] sm:$0xff] }
  0x6a   :  { %614 = vperm.xlu2 %1603, %v52_v50   ;;  %v62_v50 = vld [vmem:[%s3732_s0 + $0x198] sm:$0xff] }
  0x6b   :  { %609 = vperm.xlu1 %1602, %v51_v51   ;;  %604 = vperm.xlu0 %1601, %v50_v52   ;;  %v183_v51 = vld [vmem:[%s3733_s1 + $0x140] sm:$0xff]  ;;  %v184_v52 = vld [vmem:[%s3733_s1 + $0x148] sm:$0xff] }
  0x6c   :  { %v450_v55 = vpop.permute.xlu2 %449 }
  0x6d   :  { %v1083_v56 = vmul.f32 %v450_v55, %v159_v53  ;;  %v1084_v57 = vmul.f32 %v450_v55, %v160_v54  ;;  %v163_v53 = vld [vmem:[%s3733_s1 + $0xa0] sm:$0xff]  ;;  %v164_v54 = vld [vmem:[%s3733_s1 + $0xa8] sm:$0xff] }
  0x6f   :  { %1348 = vst [vmem:[%s3734_s2 + $0x80] sm:$0xff] %v1083_v56  ;;  %v161_v56 = vld [vmem:[%s3733_s1 + $0x90] sm:$0xff] }
  0x70   :  { %1349 = vst.msk [vmem:[%s3734_s2 + $0x88] sm:$0xff] %vm1332_vm0, %v1084_v57 }
  0x72   :  { %629 = vperm.xlu2 %1603, %v55_v58  }
  0x73   :  { %624 = vperm.xlu1 %1602, %v54_v59   ;;  %619 = vperm.xlu0 %1601, %v53_v60   ;;  %v162_v60 = vld [vmem:[%s3733_s1 + $0x98] sm:$0xff] }
  0x74   :  { %v465_v1 = vpop.permute.xlu2 %464 }
  0x75   :  { %v1089_v3 = vmul.f32 %v465_v1, %v165_v61  ;;  %v1090_v4 = vmul.f32 %v465_v1, %v166_v62  ;;  %v420_v5 = vpop.permute.xlu1 %419  ;;  %v410_v7 = vpop.permute.xlu0 %409  ;;  %v67_v1 = vld [vmem:[%s3732_s0 + $0x1c0] sm:$0xff] }
  0x76   :  { %v1071_v8 = vmul.f32 %v420_v5, %v147_v63  ;;  %v1072_v9 = vmul.f32 %v420_v5, %v148_v0  ;;  %v1067_v10 = vmul.f32 %v410_v7, %v143_v2  ;;  %v1068_v12 = vmul.f32 %v410_v7, %v144_v6  ;;  %v189_v5 = vld [vmem:[%s3733_s1 + $0x170] sm:$0xff]  ;;  %v190_v6 = vld [vmem:[%s3733_s1 + $0x178] sm:$0xff] }
  0x77   :  { %1354 = vst [vmem:[%s3734_s2 + $0xb0] sm:$0xff] %v1089_v3  ;;  %v66_v3 = vld [vmem:[%s3732_s0 + $0x1b8] sm:$0xff]  ;;  %v169_v7 = vld [vmem:[%s3733_s1 + $0xd0] sm:$0xff] }
  0x78   :  { %1355 = vst.msk [vmem:[%s3734_s2 + $0xb8] sm:$0xff] %vm1332_vm0, %v1090_v4  ;;  %v65_v4 = vld [vmem:[%s3732_s0 + $0x1b0] sm:$0xff] }
  0x79   :  { %1336 = vst [vmem:[%s3734_s2 + $0x20] sm:$0xff] %v1071_v8  ;;  %v170_v8 = vld [vmem:[%s3733_s1 + $0xd8] sm:$0xff] }
  0x7a   :  { %1337 = vst.msk [vmem:[%s3734_s2 + $0x28] sm:$0xff] %vm1332_vm0, %v1072_v9  ;;  %644 = vperm.xlu2 %1603, %v58_v11  }
  0x7b   :  { %1331 = vst [vmem:[%s3734_s2] sm:$0xff] %v1067_v10  ;;  %639 = vperm.xlu1 %1602, %v57_v13   ;;  %634 = vperm.xlu0 %1601, %v56_v14   ;;  %v167_v10 = vld [vmem:[%s3733_s1 + $0xc0] sm:$0xff]  ;;  %v168_v14 = vld [vmem:[%s3733_s1 + $0xc8] sm:$0xff] }
  0x7c   :  { %1333 = vst.msk [vmem:[%s3734_s2 + $0x8] sm:$0xff] %vm1332_vm0, %v1068_v12  ;;  %v480_v19 = vpop.permute.xlu2 %479 }
  0x7d   :  { %v1095_v21 = vmul.f32 %v480_v19, %v171_v15  ;;  %v1096_v22 = vmul.f32 %v480_v19, %v172_v16  ;;  %v425_v23 = vpop.permute.xlu1 %424  ;;  %v415_v25 = vpop.permute.xlu0 %414  ;;  %v70_v19 = vld [vmem:[%s3732_s0 + $0x1d8] sm:$0xff] }
  0x7e   :  { %v1073_v26 = vmul.f32 %v425_v23, %v149_v17  ;;  %v1074_v27 = vmul.f32 %v425_v23, %v150_v18  ;;  %v1069_v28 = vmul.f32 %v415_v25, %v145_v20  ;;  %v1070_v30 = vmul.f32 %v415_v25, %v146_v24  ;;  %v195_v23 = vld [vmem:[%s3733_s1 + $0x1a0] sm:$0xff]  ;;  %v196_v24 = vld [vmem:[%s3733_s1 + $0x1a8] sm:$0xff] }
  0x7f   :  { %1360 = vst [vmem:[%s3734_s2 + $0xe0] sm:$0xff] %v1095_v21  ;;  %v69_v21 = vld [vmem:[%s3732_s0 + $0x1d0] sm:$0xff]  ;;  %v175_v25 = vld [vmem:[%s3733_s1 + $0x100] sm:$0xff] }
  0x80   :  { %1361 = vst.msk [vmem:[%s3734_s2 + $0xe8] sm:$0xff] %vm1332_vm0, %v1096_v22  ;;  %v68_v22 = vld [vmem:[%s3732_s0 + $0x1c8] sm:$0xff] }
  0x81   :  { %1338 = vst [vmem:[%s3734_s2 + $0x30] sm:$0xff] %v1073_v26  ;;  %v176_v26 = vld [vmem:[%s3733_s1 + $0x108] sm:$0xff] }
  0x82   :  { %1339 = vst.msk [vmem:[%s3734_s2 + $0x38] sm:$0xff] %vm1332_vm0, %v1074_v27  ;;  %659 = vperm.xlu2 %1603, %v61_v29  }
  0x83   :  { %1334 = vst [vmem:[%s3734_s2 + $0x10] sm:$0xff] %v1069_v28  ;;  %654 = vperm.xlu1 %1602, %v60_v31   ;;  %649 = vperm.xlu0 %1601, %v59_v32   ;;  %v173_v28 = vld [vmem:[%s3733_s1 + $0xf0] sm:$0xff]  ;;  %v174_v32 = vld [vmem:[%s3733_s1 + $0xf8] sm:$0xff] }
  0x84   :  { %1335 = vst.msk [vmem:[%s3734_s2 + $0x18] sm:$0xff] %vm1332_vm0, %v1070_v30  ;;  %v495_v37 = vpop.permute.xlu2 %494 }
  0x85   :  { %v1101_v39 = vmul.f32 %v495_v37, %v177_v33  ;;  %v1102_v40 = vmul.f32 %v495_v37, %v178_v34  ;;  %v445_v41 = vpop.permute.xlu1 %444  ;;  %v440_v43 = vpop.permute.xlu0 %439  ;;  %v73_v37 = vld [vmem:[%s3732_s0 + $0x1f0] sm:$0xff] }
  0x86   :  { %v1081_v44 = vmul.f32 %v445_v41, %v157_v35  ;;  %v1082_v45 = vmul.f32 %v445_v41, %v158_v36  ;;  %v1079_v46 = vmul.f32 %v440_v43, %v155_v38  ;;  %v1080_v48 = vmul.f32 %v440_v43, %v156_v42  ;;  %v201_v41 = vld [vmem:[%s3733_s1 + $0x1d0] sm:$0xff]  ;;  %v202_v42 = vld [vmem:[%s3733_s1 + $0x1d8] sm:$0xff] }
  0x87   :  { %1366 = vst [vmem:[%s3734_s2 + $0x110] sm:$0xff] %v1101_v39  ;;  %v72_v39 = vld [vmem:[%s3732_s0 + $0x1e8] sm:$0xff]  ;;  %v181_v43 = vld [vmem:[%s3733_s1 + $0x130] sm:$0xff] }
  0x88   :  { %1367 = vst.msk [vmem:[%s3734_s2 + $0x118] sm:$0xff] %vm1332_vm0, %v1102_v40  ;;  %v71_v40 = vld [vmem:[%s3732_s0 + $0x1e0] sm:$0xff] }
  0x89   :  { %1346 = vst [vmem:[%s3734_s2 + $0x70] sm:$0xff] %v1081_v44  ;;  %v182_v44 = vld [vmem:[%s3733_s1 + $0x138] sm:$0xff] }
  0x8a   :  { %1347 = vst.msk [vmem:[%s3734_s2 + $0x78] sm:$0xff] %vm1332_vm0, %v1082_v45  ;;  %674 = vperm.xlu2 %1603, %v64_v47  }
  0x8b   :  { %1344 = vst [vmem:[%s3734_s2 + $0x60] sm:$0xff] %v1079_v46  ;;  %669 = vperm.xlu1 %1602, %v63_v49   ;;  %664 = vperm.xlu0 %1601, %v62_v50   ;;  %v179_v46 = vld [vmem:[%s3733_s1 + $0x120] sm:$0xff]  ;;  %v180_v50 = vld [vmem:[%s3733_s1 + $0x128] sm:$0xff] }
  0x8c   :  { %1345 = vst.msk [vmem:[%s3734_s2 + $0x68] sm:$0xff] %vm1332_vm0, %v1080_v48  ;;  %v510_v55 = vpop.permute.xlu2 %509 }
  0x8d   :  { %v1107_v57 = vmul.f32 %v510_v55, %v183_v51  ;;  %v1108_v58 = vmul.f32 %v510_v55, %v184_v52  ;;  %v460_v59 = vpop.permute.xlu1 %459  ;;  %v455_v61 = vpop.permute.xlu0 %454  ;;  %v76_v55 = vld [vmem:[%s3732_s0 + $0x208] sm:$0xff] }
  0x8e   :  { %v1087_v62 = vmul.f32 %v460_v59, %v163_v53  ;;  %v1088_v63 = vmul.f32 %v460_v59, %v164_v54  ;;  %v1085_v0 = vmul.f32 %v455_v61, %v161_v56  ;;  %v1086_v2 = vmul.f32 %v455_v61, %v162_v60  ;;  %v207_v59 = vld [vmem:[%s3733_s1 + $0x200] sm:$0xff]  ;;  %v208_v60 = vld [vmem:[%s3733_s1 + $0x208] sm:$0xff] }
  0x8f   :  { %1372 = vst [vmem:[%s3734_s2 + $0x140] sm:$0xff] %v1107_v57  ;;  %v75_v57 = vld [vmem:[%s3732_s0 + $0x200] sm:$0xff] }
  0x90   :  { %1373 = vst.msk [vmem:[%s3734_s2 + $0x148] sm:$0xff] %vm1332_vm0, %v1108_v58  ;;  %v74_v58 = vld [vmem:[%s3732_s0 + $0x1f8] sm:$0xff]  ;;  %v187_v61 = vld [vmem:[%s3733_s1 + $0x160] sm:$0xff] }
  0x91   :  { %1352 = vst [vmem:[%s3734_s2 + $0xa0] sm:$0xff] %v1087_v62  ;;  %v188_v62 = vld [vmem:[%s3733_s1 + $0x168] sm:$0xff] }
  0x92   :  { %1353 = vst.msk [vmem:[%s3734_s2 + $0xa8] sm:$0xff] %vm1332_vm0, %v1088_v63  ;;  %689 = vperm.xlu2 %1603, %v67_v1  }
  0x93   :  { %1350 = vst [vmem:[%s3734_s2 + $0x90] sm:$0xff] %v1085_v0  ;;  %684 = vperm.xlu1 %1602, %v66_v3   ;;  %679 = vperm.xlu0 %1601, %v65_v4   ;;  %v185_v0 = vld [vmem:[%s3733_s1 + $0x150] sm:$0xff]  ;;  %v186_v4 = vld [vmem:[%s3733_s1 + $0x158] sm:$0xff] }
  0x94   :  { %1351 = vst.msk [vmem:[%s3734_s2 + $0x98] sm:$0xff] %vm1332_vm0, %v1086_v2  ;;  %v525_v9 = vpop.permute.xlu2 %524 }
  0x95   :  { %v1113_v11 = vmul.f32 %v525_v9, %v189_v5  ;;  %v1114_v12 = vmul.f32 %v525_v9, %v190_v6  ;;  %v475_v13 = vpop.permute.xlu1 %474  ;;  %v470_v15 = vpop.permute.xlu0 %469  ;;  %v79_v9 = vld [vmem:[%s3732_s0 + $0x220] sm:$0xff] }
  0x96   :  { %v1093_v16 = vmul.f32 %v475_v13, %v169_v7  ;;  %v1094_v17 = vmul.f32 %v475_v13, %v170_v8  ;;  %v1091_v18 = vmul.f32 %v470_v15, %v167_v10  ;;  %v1092_v20 = vmul.f32 %v470_v15, %v168_v14  ;;  %v213_v13 = vld [vmem:[%s3733_s1 + $0x230] sm:$0xff]  ;;  %v214_v14 = vld [vmem:[%s3733_s1 + $0x238] sm:$0xff] }
  0x97   :  { %1378 = vst [vmem:[%s3734_s2 + $0x170] sm:$0xff] %v1113_v11  ;;  %v78_v11 = vld [vmem:[%s3732_s0 + $0x218] sm:$0xff]  ;;  %v193_v15 = vld [vmem:[%s3733_s1 + $0x190] sm:$0xff] }
  0x98   :  { %1379 = vst.msk [vmem:[%s3734_s2 + $0x178] sm:$0xff] %vm1332_vm0, %v1114_v12  ;;  %v77_v12 = vld [vmem:[%s3732_s0 + $0x210] sm:$0xff] }
  0x99   :  { %1358 = vst [vmem:[%s3734_s2 + $0xd0] sm:$0xff] %v1093_v16  ;;  %v194_v16 = vld [vmem:[%s3733_s1 + $0x198] sm:$0xff] }
  0x9a   :  { %1359 = vst.msk [vmem:[%s3734_s2 + $0xd8] sm:$0xff] %vm1332_vm0, %v1094_v17  ;;  %704 = vperm.xlu2 %1603, %v70_v19  }
  0x9b   :  { %1356 = vst [vmem:[%s3734_s2 + $0xc0] sm:$0xff] %v1091_v18  ;;  %699 = vperm.xlu1 %1602, %v69_v21   ;;  %694 = vperm.xlu0 %1601, %v68_v22   ;;  %v191_v18 = vld [vmem:[%s3733_s1 + $0x180] sm:$0xff]  ;;  %v192_v22 = vld [vmem:[%s3733_s1 + $0x188] sm:$0xff] }
  0x9c   :  { %1357 = vst.msk [vmem:[%s3734_s2 + $0xc8] sm:$0xff] %vm1332_vm0, %v1092_v20  ;;  %v540_v27 = vpop.permute.xlu2 %539 }
  0x9d   :  { %v1119_v29 = vmul.f32 %v540_v27, %v195_v23  ;;  %v1120_v30 = vmul.f32 %v540_v27, %v196_v24  ;;  %v490_v31 = vpop.permute.xlu1 %489  ;;  %v485_v33 = vpop.permute.xlu0 %484  ;;  %v82_v27 = vld [vmem:[%s3732_s0 + $0x238] sm:$0xff] }
  0x9e   :  { %v1099_v34 = vmul.f32 %v490_v31, %v175_v25  ;;  %v1100_v35 = vmul.f32 %v490_v31, %v176_v26  ;;  %v1097_v36 = vmul.f32 %v485_v33, %v173_v28  ;;  %v1098_v38 = vmul.f32 %v485_v33, %v174_v32  ;;  %v219_v31 = vld [vmem:[%s3733_s1 + $0x260] sm:$0xff]  ;;  %v220_v32 = vld [vmem:[%s3733_s1 + $0x268] sm:$0xff] }
  0x9f   :  { %1384 = vst [vmem:[%s3734_s2 + $0x1a0] sm:$0xff] %v1119_v29  ;;  %v81_v29 = vld [vmem:[%s3732_s0 + $0x230] sm:$0xff]  ;;  %v199_v33 = vld [vmem:[%s3733_s1 + $0x1c0] sm:$0xff] }
  0xa0   :  { %1385 = vst.msk [vmem:[%s3734_s2 + $0x1a8] sm:$0xff] %vm1332_vm0, %v1120_v30  ;;  %v80_v30 = vld [vmem:[%s3732_s0 + $0x228] sm:$0xff] }
  0xa1   :  { %1364 = vst [vmem:[%s3734_s2 + $0x100] sm:$0xff] %v1099_v34  ;;  %v200_v34 = vld [vmem:[%s3733_s1 + $0x1c8] sm:$0xff] }
  0xa2   :  { %1365 = vst.msk [vmem:[%s3734_s2 + $0x108] sm:$0xff] %vm1332_vm0, %v1100_v35  ;;  %719 = vperm.xlu2 %1603, %v73_v37  }
  0xa3   :  { %1362 = vst [vmem:[%s3734_s2 + $0xf0] sm:$0xff] %v1097_v36  ;;  %714 = vperm.xlu1 %1602, %v72_v39   ;;  %709 = vperm.xlu0 %1601, %v71_v40   ;;  %v197_v36 = vld [vmem:[%s3733_s1 + $0x1b0] sm:$0xff]  ;;  %v198_v40 = vld [vmem:[%s3733_s1 + $0x1b8] sm:$0xff] }
  0xa4   :  { %1363 = vst.msk [vmem:[%s3734_s2 + $0xf8] sm:$0xff] %vm1332_vm0, %v1098_v38  ;;  %v555_v45 = vpop.permute.xlu2 %554 }
  0xa5   :  { %v1125_v47 = vmul.f32 %v555_v45, %v201_v41  ;;  %v1126_v48 = vmul.f32 %v555_v45, %v202_v42  ;;  %v505_v49 = vpop.permute.xlu1 %504  ;;  %v500_v51 = vpop.permute.xlu0 %499  ;;  %v85_v45 = vld [vmem:[%s3732_s0 + $0x250] sm:$0xff] }
  0xa6   :  { %v1105_v52 = vmul.f32 %v505_v49, %v181_v43  ;;  %v1106_v53 = vmul.f32 %v505_v49, %v182_v44  ;;  %v1103_v54 = vmul.f32 %v500_v51, %v179_v46  ;;  %v1104_v56 = vmul.f32 %v500_v51, %v180_v50  ;;  %v225_v49 = vld [vmem:[%s3733_s1 + $0x290] sm:$0xff]  ;;  %v226_v50 = vld [vmem:[%s3733_s1 + $0x298] sm:$0xff] }
  0xa7   :  { %1390 = vst [vmem:[%s3734_s2 + $0x1d0] sm:$0xff] %v1125_v47  ;;  %v84_v47 = vld [vmem:[%s3732_s0 + $0x248] sm:$0xff]  ;;  %v205_v51 = vld [vmem:[%s3733_s1 + $0x1f0] sm:$0xff] }
  0xa8   :  { %1391 = vst.msk [vmem:[%s3734_s2 + $0x1d8] sm:$0xff] %vm1332_vm0, %v1126_v48  ;;  %v83_v48 = vld [vmem:[%s3732_s0 + $0x240] sm:$0xff] }
  0xa9   :  { %1370 = vst [vmem:[%s3734_s2 + $0x130] sm:$0xff] %v1105_v52  ;;  %v206_v52 = vld [vmem:[%s3733_s1 + $0x1f8] sm:$0xff] }
  0xaa   :  { %1371 = vst.msk [vmem:[%s3734_s2 + $0x138] sm:$0xff] %vm1332_vm0, %v1106_v53  ;;  %734 = vperm.xlu2 %1603, %v76_v55  }
  0xab   :  { %1368 = vst [vmem:[%s3734_s2 + $0x120] sm:$0xff] %v1103_v54  ;;  %729 = vperm.xlu1 %1602, %v75_v57   ;;  %724 = vperm.xlu0 %1601, %v74_v58   ;;  %v203_v54 = vld [vmem:[%s3733_s1 + $0x1e0] sm:$0xff]  ;;  %v204_v58 = vld [vmem:[%s3733_s1 + $0x1e8] sm:$0xff] }
  0xac   :  { %1369 = vst.msk [vmem:[%s3734_s2 + $0x128] sm:$0xff] %vm1332_vm0, %v1104_v56  ;;  %v570_v63 = vpop.permute.xlu2 %569 }
  0xad   :  { %v1131_v1 = vmul.f32 %v570_v63, %v207_v59  ;;  %v1132_v2 = vmul.f32 %v570_v63, %v208_v60  ;;  %v520_v3 = vpop.permute.xlu1 %519  ;;  %v515_v5 = vpop.permute.xlu0 %514  ;;  %v88_v63 = vld [vmem:[%s3732_s0 + $0x268] sm:$0xff] }
  0xae   :  { %v1111_v6 = vmul.f32 %v520_v3, %v187_v61  ;;  %v1112_v7 = vmul.f32 %v520_v3, %v188_v62  ;;  %v1109_v8 = vmul.f32 %v515_v5, %v185_v0  ;;  %v1110_v10 = vmul.f32 %v515_v5, %v186_v4  ;;  %v231_v3 = vld [vmem:[%s3733_s1 + $0x2c0] sm:$0xff]  ;;  %v232_v4 = vld [vmem:[%s3733_s1 + $0x2c8] sm:$0xff] }
  0xaf   :  { %1396 = vst [vmem:[%s3734_s2 + $0x200] sm:$0xff] %v1131_v1  ;;  %v87_v1 = vld [vmem:[%s3732_s0 + $0x260] sm:$0xff] }
  0xb0   :  { %1397 = vst.msk [vmem:[%s3734_s2 + $0x208] sm:$0xff] %vm1332_vm0, %v1132_v2  ;;  %v86_v2 = vld [vmem:[%s3732_s0 + $0x258] sm:$0xff]  ;;  %v211_v5 = vld [vmem:[%s3733_s1 + $0x220] sm:$0xff] }
  0xb1   :  { %1376 = vst [vmem:[%s3734_s2 + $0x160] sm:$0xff] %v1111_v6  ;;  %v212_v6 = vld [vmem:[%s3733_s1 + $0x228] sm:$0xff] }
  0xb2   :  { %1377 = vst.msk [vmem:[%s3734_s2 + $0x168] sm:$0xff] %vm1332_vm0, %v1112_v7  ;;  %749 = vperm.xlu2 %1603, %v79_v9  }
  0xb3   :  { %1374 = vst [vmem:[%s3734_s2 + $0x150] sm:$0xff] %v1109_v8  ;;  %744 = vperm.xlu1 %1602, %v78_v11   ;;  %739 = vperm.xlu0 %1601, %v77_v12   ;;  %v209_v8 = vld [vmem:[%s3733_s1 + $0x210] sm:$0xff]  ;;  %v210_v12 = vld [vmem:[%s3733_s1 + $0x218] sm:$0xff] }
  0xb4   :  { %1375 = vst.msk [vmem:[%s3734_s2 + $0x158] sm:$0xff] %vm1332_vm0, %v1110_v10  ;;  %v585_v17 = vpop.permute.xlu2 %584 }
  0xb5   :  { %v1137_v19 = vmul.f32 %v585_v17, %v213_v13  ;;  %v1138_v20 = vmul.f32 %v585_v17, %v214_v14  ;;  %v535_v21 = vpop.permute.xlu1 %534  ;;  %v530_v23 = vpop.permute.xlu0 %529  ;;  %v91_v17 = vld [vmem:[%s3732_s0 + $0x280] sm:$0xff] }
  0xb6   :  { %v1117_v24 = vmul.f32 %v535_v21, %v193_v15  ;;  %v1118_v25 = vmul.f32 %v535_v21, %v194_v16  ;;  %v1115_v26 = vmul.f32 %v530_v23, %v191_v18  ;;  %v1116_v28 = vmul.f32 %v530_v23, %v192_v22  ;;  %v237_v21 = vld [vmem:[%s3733_s1 + $0x2f0] sm:$0xff]  ;;  %v238_v22 = vld [vmem:[%s3733_s1 + $0x2f8] sm:$0xff] }
  0xb7   :  { %1402 = vst [vmem:[%s3734_s2 + $0x230] sm:$0xff] %v1137_v19  ;;  %v90_v19 = vld [vmem:[%s3732_s0 + $0x278] sm:$0xff]  ;;  %v217_v23 = vld [vmem:[%s3733_s1 + $0x250] sm:$0xff] }
  0xb8   :  { %1403 = vst.msk [vmem:[%s3734_s2 + $0x238] sm:$0xff] %vm1332_vm0, %v1138_v20  ;;  %v89_v20 = vld [vmem:[%s3732_s0 + $0x270] sm:$0xff] }
  0xb9   :  { %1382 = vst [vmem:[%s3734_s2 + $0x190] sm:$0xff] %v1117_v24  ;;  %v218_v24 = vld [vmem:[%s3733_s1 + $0x258] sm:$0xff] }
  0xba   :  { %1383 = vst.msk [vmem:[%s3734_s2 + $0x198] sm:$0xff] %vm1332_vm0, %v1118_v25  ;;  %764 = vperm.xlu2 %1603, %v82_v27  }
  0xbb   :  { %1380 = vst [vmem:[%s3734_s2 + $0x180] sm:$0xff] %v1115_v26  ;;  %759 = vperm.xlu1 %1602, %v81_v29   ;;  %754 = vperm.xlu0 %1601, %v80_v30   ;;  %v215_v26 = vld [vmem:[%s3733_s1 + $0x240] sm:$0xff]  ;;  %v216_v30 = vld [vmem:[%s3733_s1 + $0x248] sm:$0xff] }
  0xbc   :  { %1381 = vst.msk [vmem:[%s3734_s2 + $0x188] sm:$0xff] %vm1332_vm0, %v1116_v28  ;;  %v600_v35 = vpop.permute.xlu2 %599 }
  0xbd   :  { %v1143_v37 = vmul.f32 %v600_v35, %v219_v31  ;;  %v1144_v38 = vmul.f32 %v600_v35, %v220_v32  ;;  %v550_v39 = vpop.permute.xlu1 %549  ;;  %v545_v41 = vpop.permute.xlu0 %544  ;;  %v94_v35 = vld [vmem:[%s3732_s0 + $0x298] sm:$0xff] }
  0xbe   :  { %v1123_v42 = vmul.f32 %v550_v39, %v199_v33  ;;  %v1124_v43 = vmul.f32 %v550_v39, %v200_v34  ;;  %v1121_v44 = vmul.f32 %v545_v41, %v197_v36  ;;  %v1122_v46 = vmul.f32 %v545_v41, %v198_v40  ;;  %v243_v39 = vld [vmem:[%s3733_s1 + $0x320] sm:$0xff]  ;;  %v244_v40 = vld [vmem:[%s3733_s1 + $0x328] sm:$0xff] }
  0xbf   :  { %1408 = vst [vmem:[%s3734_s2 + $0x260] sm:$0xff] %v1143_v37  ;;  %v93_v37 = vld [vmem:[%s3732_s0 + $0x290] sm:$0xff]  ;;  %v223_v41 = vld [vmem:[%s3733_s1 + $0x280] sm:$0xff] }
  0xc0   :  { %1409 = vst.msk [vmem:[%s3734_s2 + $0x268] sm:$0xff] %vm1332_vm0, %v1144_v38  ;;  %v92_v38 = vld [vmem:[%s3732_s0 + $0x288] sm:$0xff] }
  0xc1   :  { %1388 = vst [vmem:[%s3734_s2 + $0x1c0] sm:$0xff] %v1123_v42  ;;  %v224_v42 = vld [vmem:[%s3733_s1 + $0x288] sm:$0xff] }
  0xc2   :  { %1389 = vst.msk [vmem:[%s3734_s2 + $0x1c8] sm:$0xff] %vm1332_vm0, %v1124_v43  ;;  %779 = vperm.xlu2 %1603, %v85_v45  }
  0xc3   :  { %1386 = vst [vmem:[%s3734_s2 + $0x1b0] sm:$0xff] %v1121_v44  ;;  %774 = vperm.xlu1 %1602, %v84_v47   ;;  %769 = vperm.xlu0 %1601, %v83_v48   ;;  %v221_v44 = vld [vmem:[%s3733_s1 + $0x270] sm:$0xff]  ;;  %v222_v48 = vld [vmem:[%s3733_s1 + $0x278] sm:$0xff] }
  0xc4   :  { %1387 = vst.msk [vmem:[%s3734_s2 + $0x1b8] sm:$0xff] %vm1332_vm0, %v1122_v46  ;;  %v615_v53 = vpop.permute.xlu2 %614 }
  0xc5   :  { %v1149_v55 = vmul.f32 %v615_v53, %v225_v49  ;;  %v1150_v56 = vmul.f32 %v615_v53, %v226_v50  ;;  %v565_v57 = vpop.permute.xlu1 %564  ;;  %v560_v59 = vpop.permute.xlu0 %559  ;;  %v97_v53 = vld [vmem:[%s3732_s0 + $0x2b0] sm:$0xff] }
  0xc6   :  { %v1129_v60 = vmul.f32 %v565_v57, %v205_v51  ;;  %v1130_v61 = vmul.f32 %v565_v57, %v206_v52  ;;  %v1127_v62 = vmul.f32 %v560_v59, %v203_v54  ;;  %v1128_v0 = vmul.f32 %v560_v59, %v204_v58  ;;  %v249_v57 = vld [vmem:[%s3733_s1 + $0x350] sm:$0xff]  ;;  %v250_v58 = vld [vmem:[%s3733_s1 + $0x358] sm:$0xff] }
  0xc7   :  { %1414 = vst [vmem:[%s3734_s2 + $0x290] sm:$0xff] %v1149_v55  ;;  %v96_v55 = vld [vmem:[%s3732_s0 + $0x2a8] sm:$0xff]  ;;  %v229_v59 = vld [vmem:[%s3733_s1 + $0x2b0] sm:$0xff] }
  0xc8   :  { %1415 = vst.msk [vmem:[%s3734_s2 + $0x298] sm:$0xff] %vm1332_vm0, %v1150_v56  ;;  %v95_v56 = vld [vmem:[%s3732_s0 + $0x2a0] sm:$0xff] }
  0xc9   :  { %1394 = vst [vmem:[%s3734_s2 + $0x1f0] sm:$0xff] %v1129_v60  ;;  %v230_v60 = vld [vmem:[%s3733_s1 + $0x2b8] sm:$0xff] }
  0xca   :  { %1395 = vst.msk [vmem:[%s3734_s2 + $0x1f8] sm:$0xff] %vm1332_vm0, %v1130_v61  ;;  %794 = vperm.xlu2 %1603, %v88_v63  }
  0xcb   :  { %1392 = vst [vmem:[%s3734_s2 + $0x1e0] sm:$0xff] %v1127_v62  ;;  %789 = vperm.xlu1 %1602, %v87_v1   ;;  %784 = vperm.xlu0 %1601, %v86_v2   ;;  %v227_v62 = vld [vmem:[%s3733_s1 + $0x2a0] sm:$0xff]  ;;  %v228_v2 = vld [vmem:[%s3733_s1 + $0x2a8] sm:$0xff] }
  0xcc   :  { %1393 = vst.msk [vmem:[%s3734_s2 + $0x1e8] sm:$0xff] %vm1332_vm0, %v1128_v0  ;;  %v630_v7 = vpop.permute.xlu2 %629 }
  0xcd   :  { %v1155_v9 = vmul.f32 %v630_v7, %v231_v3  ;;  %v1156_v10 = vmul.f32 %v630_v7, %v232_v4  ;;  %v580_v11 = vpop.permute.xlu1 %579  ;;  %v575_v13 = vpop.permute.xlu0 %574  ;;  %v100_v7 = vld [vmem:[%s3732_s0 + $0x2c8] sm:$0xff] }
  0xce   :  { %v1135_v14 = vmul.f32 %v580_v11, %v211_v5  ;;  %v1136_v15 = vmul.f32 %v580_v11, %v212_v6  ;;  %v1133_v16 = vmul.f32 %v575_v13, %v209_v8  ;;  %v1134_v18 = vmul.f32 %v575_v13, %v210_v12  ;;  %v255_v11 = vld [vmem:[%s3733_s1 + $0x380] sm:$0xff]  ;;  %v256_v12 = vld [vmem:[%s3733_s1 + $0x388] sm:$0xff] }
  0xcf   :  { %1420 = vst [vmem:[%s3734_s2 + $0x2c0] sm:$0xff] %v1155_v9  ;;  %v99_v9 = vld [vmem:[%s3732_s0 + $0x2c0] sm:$0xff] }
  0xd0   :  { %1421 = vst.msk [vmem:[%s3734_s2 + $0x2c8] sm:$0xff] %vm1332_vm0, %v1156_v10  ;;  %v98_v10 = vld [vmem:[%s3732_s0 + $0x2b8] sm:$0xff]  ;;  %v235_v13 = vld [vmem:[%s3733_s1 + $0x2e0] sm:$0xff] }
  0xd1   :  { %1400 = vst [vmem:[%s3734_s2 + $0x220] sm:$0xff] %v1135_v14  ;;  %v236_v14 = vld [vmem:[%s3733_s1 + $0x2e8] sm:$0xff] }
  0xd2   :  { %1401 = vst.msk [vmem:[%s3734_s2 + $0x228] sm:$0xff] %vm1332_vm0, %v1136_v15  ;;  %809 = vperm.xlu2 %1603, %v91_v17  }
  0xd3   :  { %1398 = vst [vmem:[%s3734_s2 + $0x210] sm:$0xff] %v1133_v16  ;;  %804 = vperm.xlu1 %1602, %v90_v19   ;;  %799 = vperm.xlu0 %1601, %v89_v20   ;;  %v233_v16 = vld [vmem:[%s3733_s1 + $0x2d0] sm:$0xff]  ;;  %v234_v20 = vld [vmem:[%s3733_s1 + $0x2d8] sm:$0xff] }
  0xd4   :  { %1399 = vst.msk [vmem:[%s3734_s2 + $0x218] sm:$0xff] %vm1332_vm0, %v1134_v18  ;;  %v645_v25 = vpop.permute.xlu2 %644 }
  0xd5   :  { %v1161_v27 = vmul.f32 %v645_v25, %v237_v21  ;;  %v1162_v28 = vmul.f32 %v645_v25, %v238_v22  ;;  %v595_v29 = vpop.permute.xlu1 %594  ;;  %v590_v31 = vpop.permute.xlu0 %589  ;;  %v103_v25 = vld [vmem:[%s3732_s0 + $0x2e0] sm:$0xff] }
  0xd6   :  { %v1141_v32 = vmul.f32 %v595_v29, %v217_v23  ;;  %v1142_v33 = vmul.f32 %v595_v29, %v218_v24  ;;  %v1139_v34 = vmul.f32 %v590_v31, %v215_v26  ;;  %v1140_v36 = vmul.f32 %v590_v31, %v216_v30  ;;  %v261_v29 = vld [vmem:[%s3733_s1 + $0x3b0] sm:$0xff]  ;;  %v262_v30 = vld [vmem:[%s3733_s1 + $0x3b8] sm:$0xff] }
  0xd7   :  { %1426 = vst [vmem:[%s3734_s2 + $0x2f0] sm:$0xff] %v1161_v27  ;;  %v102_v27 = vld [vmem:[%s3732_s0 + $0x2d8] sm:$0xff]  ;;  %v241_v31 = vld [vmem:[%s3733_s1 + $0x310] sm:$0xff] }
  0xd8   :  { %1427 = vst.msk [vmem:[%s3734_s2 + $0x2f8] sm:$0xff] %vm1332_vm0, %v1162_v28  ;;  %v101_v28 = vld [vmem:[%s3732_s0 + $0x2d0] sm:$0xff] }
  0xd9   :  { %1406 = vst [vmem:[%s3734_s2 + $0x250] sm:$0xff] %v1141_v32  ;;  %v242_v32 = vld [vmem:[%s3733_s1 + $0x318] sm:$0xff] }
  0xda   :  { %1407 = vst.msk [vmem:[%s3734_s2 + $0x258] sm:$0xff] %vm1332_vm0, %v1142_v33  ;;  %824 = vperm.xlu2 %1603, %v94_v35  }
  0xdb   :  { %1404 = vst [vmem:[%s3734_s2 + $0x240] sm:$0xff] %v1139_v34  ;;  %819 = vperm.xlu1 %1602, %v93_v37   ;;  %814 = vperm.xlu0 %1601, %v92_v38   ;;  %v239_v34 = vld [vmem:[%s3733_s1 + $0x300] sm:$0xff]  ;;  %v240_v38 = vld [vmem:[%s3733_s1 + $0x308] sm:$0xff] }
  0xdc   :  { %1405 = vst.msk [vmem:[%s3734_s2 + $0x248] sm:$0xff] %vm1332_vm0, %v1140_v36  ;;  %v660_v43 = vpop.permute.xlu2 %659 }
  0xdd   :  { %v1167_v45 = vmul.f32 %v660_v43, %v243_v39  ;;  %v1168_v46 = vmul.f32 %v660_v43, %v244_v40  ;;  %v610_v47 = vpop.permute.xlu1 %609  ;;  %v605_v49 = vpop.permute.xlu0 %604  ;;  %v106_v43 = vld [vmem:[%s3732_s0 + $0x2f8] sm:$0xff] }
  0xde   :  { %v1147_v50 = vmul.f32 %v610_v47, %v223_v41  ;;  %v1148_v51 = vmul.f32 %v610_v47, %v224_v42  ;;  %v1145_v52 = vmul.f32 %v605_v49, %v221_v44  ;;  %v1146_v54 = vmul.f32 %v605_v49, %v222_v48  ;;  %v267_v47 = vld [vmem:[%s3733_s1 + $0x3e0] sm:$0xff]  ;;  %v268_v48 = vld [vmem:[%s3733_s1 + $0x3e8] sm:$0xff] }
  0xdf   :  { %1432 = vst [vmem:[%s3734_s2 + $0x320] sm:$0xff] %v1167_v45  ;;  %v105_v45 = vld [vmem:[%s3732_s0 + $0x2f0] sm:$0xff]  ;;  %v247_v49 = vld [vmem:[%s3733_s1 + $0x340] sm:$0xff] }
  0xe0   :  { %1433 = vst.msk [vmem:[%s3734_s2 + $0x328] sm:$0xff] %vm1332_vm0, %v1168_v46  ;;  %v104_v46 = vld [vmem:[%s3732_s0 + $0x2e8] sm:$0xff] }
  0xe1   :  { %1412 = vst [vmem:[%s3734_s2 + $0x280] sm:$0xff] %v1147_v50  ;;  %v248_v50 = vld [vmem:[%s3733_s1 + $0x348] sm:$0xff] }
  0xe2   :  { %1413 = vst.msk [vmem:[%s3734_s2 + $0x288] sm:$0xff] %vm1332_vm0, %v1148_v51  ;;  %839 = vperm.xlu2 %1603, %v97_v53  }
  0xe3   :  { %1410 = vst [vmem:[%s3734_s2 + $0x270] sm:$0xff] %v1145_v52  ;;  %834 = vperm.xlu1 %1602, %v96_v55   ;;  %829 = vperm.xlu0 %1601, %v95_v56   ;;  %v245_v52 = vld [vmem:[%s3733_s1 + $0x330] sm:$0xff]  ;;  %v246_v56 = vld [vmem:[%s3733_s1 + $0x338] sm:$0xff] }
  0xe4   :  { %1411 = vst.msk [vmem:[%s3734_s2 + $0x278] sm:$0xff] %vm1332_vm0, %v1146_v54  ;;  %v675_v61 = vpop.permute.xlu2 %674 }
  0xe5   :  { %v1173_v63 = vmul.f32 %v675_v61, %v249_v57  ;;  %v1174_v0 = vmul.f32 %v675_v61, %v250_v58  ;;  %v625_v1 = vpop.permute.xlu1 %624  ;;  %v620_v3 = vpop.permute.xlu0 %619  ;;  %v109_v61 = vld [vmem:[%s3732_s0 + $0x310] sm:$0xff] }
  0xe6   :  { %v1153_v4 = vmul.f32 %v625_v1, %v229_v59  ;;  %v1154_v5 = vmul.f32 %v625_v1, %v230_v60  ;;  %v1151_v6 = vmul.f32 %v620_v3, %v227_v62  ;;  %v1152_v8 = vmul.f32 %v620_v3, %v228_v2  ;;  %v273_v1 = vld [vmem:[%s3733_s1 + $0x410] sm:$0xff]  ;;  %v274_v2 = vld [vmem:[%s3733_s1 + $0x418] sm:$0xff] }
  0xe7   :  { %1438 = vst [vmem:[%s3734_s2 + $0x350] sm:$0xff] %v1173_v63  ;;  %v108_v63 = vld [vmem:[%s3732_s0 + $0x308] sm:$0xff]  ;;  %v253_v3 = vld [vmem:[%s3733_s1 + $0x370] sm:$0xff] }
  0xe8   :  { %1439 = vst.msk [vmem:[%s3734_s2 + $0x358] sm:$0xff] %vm1332_vm0, %v1174_v0  ;;  %v107_v0 = vld [vmem:[%s3732_s0 + $0x300] sm:$0xff] }
  0xe9   :  { %1418 = vst [vmem:[%s3734_s2 + $0x2b0] sm:$0xff] %v1153_v4  ;;  %v254_v4 = vld [vmem:[%s3733_s1 + $0x378] sm:$0xff] }
  0xea   :  { %1419 = vst.msk [vmem:[%s3734_s2 + $0x2b8] sm:$0xff] %vm1332_vm0, %v1154_v5  ;;  %854 = vperm.xlu2 %1603, %v100_v7  }
  0xeb   :  { %1416 = vst [vmem:[%s3734_s2 + $0x2a0] sm:$0xff] %v1151_v6  ;;  %849 = vperm.xlu1 %1602, %v99_v9   ;;  %844 = vperm.xlu0 %1601, %v98_v10   ;;  %v251_v6 = vld [vmem:[%s3733_s1 + $0x360] sm:$0xff]  ;;  %v252_v10 = vld [vmem:[%s3733_s1 + $0x368] sm:$0xff] }
  0xec   :  { %1417 = vst.msk [vmem:[%s3734_s2 + $0x2a8] sm:$0xff] %vm1332_vm0, %v1152_v8  ;;  %v690_v15 = vpop.permute.xlu2 %689 }
  0xed   :  { %v1179_v17 = vmul.f32 %v690_v15, %v255_v11  ;;  %v1180_v18 = vmul.f32 %v690_v15, %v256_v12  ;;  %v640_v19 = vpop.permute.xlu1 %639  ;;  %v635_v21 = vpop.permute.xlu0 %634  ;;  %v112_v15 = vld [vmem:[%s3732_s0 + $0x328] sm:$0xff] }
  0xee   :  { %v1159_v22 = vmul.f32 %v640_v19, %v235_v13  ;;  %v1160_v23 = vmul.f32 %v640_v19, %v236_v14  ;;  %v1157_v24 = vmul.f32 %v635_v21, %v233_v16  ;;  %v1158_v26 = vmul.f32 %v635_v21, %v234_v20  ;;  %v279_v19 = vld [vmem:[%s3733_s1 + $0x440] sm:$0xff]  ;;  %v280_v20 = vld [vmem:[%s3733_s1 + $0x448] sm:$0xff] }
  0xef   :  { %1444 = vst [vmem:[%s3734_s2 + $0x380] sm:$0xff] %v1179_v17  ;;  %v111_v17 = vld [vmem:[%s3732_s0 + $0x320] sm:$0xff] }
  0xf0   :  { %1445 = vst.msk [vmem:[%s3734_s2 + $0x388] sm:$0xff] %vm1332_vm0, %v1180_v18  ;;  %v110_v18 = vld [vmem:[%s3732_s0 + $0x318] sm:$0xff]  ;;  %v259_v21 = vld [vmem:[%s3733_s1 + $0x3a0] sm:$0xff] }
  0xf1   :  { %1424 = vst [vmem:[%s3734_s2 + $0x2e0] sm:$0xff] %v1159_v22  ;;  %v260_v22 = vld [vmem:[%s3733_s1 + $0x3a8] sm:$0xff] }
  0xf2   :  { %1425 = vst.msk [vmem:[%s3734_s2 + $0x2e8] sm:$0xff] %vm1332_vm0, %v1160_v23  ;;  %869 = vperm.xlu2 %1603, %v103_v25  }
  0xf3   :  { %1422 = vst [vmem:[%s3734_s2 + $0x2d0] sm:$0xff] %v1157_v24  ;;  %864 = vperm.xlu1 %1602, %v102_v27   ;;  %859 = vperm.xlu0 %1601, %v101_v28   ;;  %v257_v24 = vld [vmem:[%s3733_s1 + $0x390] sm:$0xff]  ;;  %v258_v28 = vld [vmem:[%s3733_s1 + $0x398] sm:$0xff] }
  0xf4   :  { %1423 = vst.msk [vmem:[%s3734_s2 + $0x2d8] sm:$0xff] %vm1332_vm0, %v1158_v26  ;;  %v705_v33 = vpop.permute.xlu2 %704 }
  0xf5   :  { %v1185_v35 = vmul.f32 %v705_v33, %v261_v29  ;;  %v1186_v36 = vmul.f32 %v705_v33, %v262_v30  ;;  %v655_v37 = vpop.permute.xlu1 %654  ;;  %v650_v39 = vpop.permute.xlu0 %649  ;;  %v115_v33 = vld [vmem:[%s3732_s0 + $0x340] sm:$0xff] }
  0xf6   :  { %v1165_v40 = vmul.f32 %v655_v37, %v241_v31  ;;  %v1166_v41 = vmul.f32 %v655_v37, %v242_v32  ;;  %v1163_v42 = vmul.f32 %v650_v39, %v239_v34  ;;  %v1164_v44 = vmul.f32 %v650_v39, %v240_v38  ;;  %v285_v37 = vld [vmem:[%s3733_s1 + $0x470] sm:$0xff]  ;;  %v286_v38 = vld [vmem:[%s3733_s1 + $0x478] sm:$0xff] }
  0xf7   :  { %1450 = vst [vmem:[%s3734_s2 + $0x3b0] sm:$0xff] %v1185_v35  ;;  %v114_v35 = vld [vmem:[%s3732_s0 + $0x338] sm:$0xff]  ;;  %v265_v39 = vld [vmem:[%s3733_s1 + $0x3d0] sm:$0xff] }
  0xf8   :  { %1451 = vst.msk [vmem:[%s3734_s2 + $0x3b8] sm:$0xff] %vm1332_vm0, %v1186_v36  ;;  %v113_v36 = vld [vmem:[%s3732_s0 + $0x330] sm:$0xff] }
  0xf9   :  { %1430 = vst [vmem:[%s3734_s2 + $0x310] sm:$0xff] %v1165_v40  ;;  %v266_v40 = vld [vmem:[%s3733_s1 + $0x3d8] sm:$0xff] }
  0xfa   :  { %1431 = vst.msk [vmem:[%s3734_s2 + $0x318] sm:$0xff] %vm1332_vm0, %v1166_v41  ;;  %884 = vperm.xlu2 %1603, %v106_v43  }
  0xfb   :  { %1428 = vst [vmem:[%s3734_s2 + $0x300] sm:$0xff] %v1163_v42  ;;  %879 = vperm.xlu1 %1602, %v105_v45   ;;  %874 = vperm.xlu0 %1601, %v104_v46   ;;  %v263_v42 = vld [vmem:[%s3733_s1 + $0x3c0] sm:$0xff]  ;;  %v264_v46 = vld [vmem:[%s3733_s1 + $0x3c8] sm:$0xff] }
  0xfc   :  { %1429 = vst.msk [vmem:[%s3734_s2 + $0x308] sm:$0xff] %vm1332_vm0, %v1164_v44  ;;  %v720_v51 = vpop.permute.xlu2 %719 }
  0xfd   :  { %v1191_v53 = vmul.f32 %v720_v51, %v267_v47  ;;  %v1192_v54 = vmul.f32 %v720_v51, %v268_v48  ;;  %v670_v55 = vpop.permute.xlu1 %669  ;;  %v665_v57 = vpop.permute.xlu0 %664  ;;  %v118_v51 = vld [vmem:[%s3732_s0 + $0x358] sm:$0xff] }
  0xfe   :  { %v1171_v58 = vmul.f32 %v670_v55, %v247_v49  ;;  %v1172_v59 = vmul.f32 %v670_v55, %v248_v50  ;;  %v1169_v60 = vmul.f32 %v665_v57, %v245_v52  ;;  %v1170_v62 = vmul.f32 %v665_v57, %v246_v56  ;;  %v291_v55 = vld [vmem:[%s3733_s1 + $0x4a0] sm:$0xff]  ;;  %v292_v56 = vld [vmem:[%s3733_s1 + $0x4a8] sm:$0xff] }
  0xff   :  { %1456 = vst [vmem:[%s3734_s2 + $0x3e0] sm:$0xff] %v1191_v53  ;;  %v117_v53 = vld [vmem:[%s3732_s0 + $0x350] sm:$0xff]  ;;  %v271_v57 = vld [vmem:[%s3733_s1 + $0x400] sm:$0xff] }
 0x100   :  { %1457 = vst.msk [vmem:[%s3734_s2 + $0x3e8] sm:$0xff] %vm1332_vm0, %v1192_v54  ;;  %v116_v54 = vld [vmem:[%s3732_s0 + $0x348] sm:$0xff] }
 0x101   :  { %1436 = vst [vmem:[%s3734_s2 + $0x340] sm:$0xff] %v1171_v58  ;;  %v272_v58 = vld [vmem:[%s3733_s1 + $0x408] sm:$0xff] }
 0x102   :  { %1437 = vst.msk [vmem:[%s3734_s2 + $0x348] sm:$0xff] %vm1332_vm0, %v1172_v59  ;;  %899 = vperm.xlu2 %1603, %v109_v61  }
 0x103   :  { %1434 = vst [vmem:[%s3734_s2 + $0x330] sm:$0xff] %v1169_v60  ;;  %894 = vperm.xlu1 %1602, %v108_v63   ;;  %889 = vperm.xlu0 %1601, %v107_v0   ;;  %v269_v60 = vld [vmem:[%s3733_s1 + $0x3f0] sm:$0xff]  ;;  %v270_v0 = vld [vmem:[%s3733_s1 + $0x3f8] sm:$0xff] }
 0x104   :  { %1435 = vst.msk [vmem:[%s3734_s2 + $0x338] sm:$0xff] %vm1332_vm0, %v1170_v62  ;;  %v735_v5 = vpop.permute.xlu2 %734 }
 0x105   :  { %v1197_v7 = vmul.f32 %v735_v5, %v273_v1  ;;  %v1198_v8 = vmul.f32 %v735_v5, %v274_v2  ;;  %v685_v9 = vpop.permute.xlu1 %684  ;;  %v680_v11 = vpop.permute.xlu0 %679  ;;  %v121_v5 = vld [vmem:[%s3732_s0 + $0x370] sm:$0xff] }
 0x106   :  { %v1177_v12 = vmul.f32 %v685_v9, %v253_v3  ;;  %v1178_v13 = vmul.f32 %v685_v9, %v254_v4  ;;  %v1175_v14 = vmul.f32 %v680_v11, %v251_v6  ;;  %v1176_v16 = vmul.f32 %v680_v11, %v252_v10  ;;  %v297_v9 = vld [vmem:[%s3733_s1 + $0x4d0] sm:$0xff]  ;;  %v298_v10 = vld [vmem:[%s3733_s1 + $0x4d8] sm:$0xff] }
 0x107   :  { %1462 = vst [vmem:[%s3734_s2 + $0x410] sm:$0xff] %v1197_v7  ;;  %v120_v7 = vld [vmem:[%s3732_s0 + $0x368] sm:$0xff]  ;;  %v277_v11 = vld [vmem:[%s3733_s1 + $0x430] sm:$0xff] }
 0x108   :  { %1463 = vst.msk [vmem:[%s3734_s2 + $0x418] sm:$0xff] %vm1332_vm0, %v1198_v8  ;;  %v119_v8 = vld [vmem:[%s3732_s0 + $0x360] sm:$0xff] }
 0x109   :  { %1442 = vst [vmem:[%s3734_s2 + $0x370] sm:$0xff] %v1177_v12  ;;  %v278_v12 = vld [vmem:[%s3733_s1 + $0x438] sm:$0xff] }
 0x10a   :  { %1443 = vst.msk [vmem:[%s3734_s2 + $0x378] sm:$0xff] %vm1332_vm0, %v1178_v13  ;;  %914 = vperm.xlu2 %1603, %v112_v15  }
 0x10b   :  { %1440 = vst [vmem:[%s3734_s2 + $0x360] sm:$0xff] %v1175_v14  ;;  %909 = vperm.xlu1 %1602, %v111_v17   ;;  %904 = vperm.xlu0 %1601, %v110_v18   ;;  %v275_v14 = vld [vmem:[%s3733_s1 + $0x420] sm:$0xff]  ;;  %v276_v18 = vld [vmem:[%s3733_s1 + $0x428] sm:$0xff] }
 0x10c   :  { %1441 = vst.msk [vmem:[%s3734_s2 + $0x368] sm:$0xff] %vm1332_vm0, %v1176_v16  ;;  %v750_v23 = vpop.permute.xlu2 %749 }
 0x10d   :  { %v1203_v25 = vmul.f32 %v750_v23, %v279_v19  ;;  %v1204_v26 = vmul.f32 %v750_v23, %v280_v20  ;;  %v700_v27 = vpop.permute.xlu1 %699  ;;  %v695_v29 = vpop.permute.xlu0 %694  ;;  %v124_v23 = vld [vmem:[%s3732_s0 + $0x388] sm:$0xff] }
 0x10e   :  { %v1183_v30 = vmul.f32 %v700_v27, %v259_v21  ;;  %v1184_v31 = vmul.f32 %v700_v27, %v260_v22  ;;  %v1181_v32 = vmul.f32 %v695_v29, %v257_v24  ;;  %v1182_v34 = vmul.f32 %v695_v29, %v258_v28  ;;  %v303_v27 = vld [vmem:[%s3733_s1 + $0x500] sm:$0xff]  ;;  %v304_v28 = vld [vmem:[%s3733_s1 + $0x508] sm:$0xff] }
 0x10f   :  { %1468 = vst [vmem:[%s3734_s2 + $0x440] sm:$0xff] %v1203_v25  ;;  %v123_v25 = vld [vmem:[%s3732_s0 + $0x380] sm:$0xff] }
 0x110   :  { %1469 = vst.msk [vmem:[%s3734_s2 + $0x448] sm:$0xff] %vm1332_vm0, %v1204_v26  ;;  %v122_v26 = vld [vmem:[%s3732_s0 + $0x378] sm:$0xff]  ;;  %v283_v29 = vld [vmem:[%s3733_s1 + $0x460] sm:$0xff] }
 0x111   :  { %1448 = vst [vmem:[%s3734_s2 + $0x3a0] sm:$0xff] %v1183_v30  ;;  %v284_v30 = vld [vmem:[%s3733_s1 + $0x468] sm:$0xff] }
 0x112   :  { %1449 = vst.msk [vmem:[%s3734_s2 + $0x3a8] sm:$0xff] %vm1332_vm0, %v1184_v31  ;;  %929 = vperm.xlu2 %1603, %v115_v33  }
 0x113   :  { %1446 = vst [vmem:[%s3734_s2 + $0x390] sm:$0xff] %v1181_v32  ;;  %924 = vperm.xlu1 %1602, %v114_v35   ;;  %919 = vperm.xlu0 %1601, %v113_v36   ;;  %v281_v32 = vld [vmem:[%s3733_s1 + $0x450] sm:$0xff]  ;;  %v282_v36 = vld [vmem:[%s3733_s1 + $0x458] sm:$0xff] }
 0x114   :  { %1447 = vst.msk [vmem:[%s3734_s2 + $0x398] sm:$0xff] %vm1332_vm0, %v1182_v34  ;;  %v765_v41 = vpop.permute.xlu2 %764 }
 0x115   :  { %v1209_v43 = vmul.f32 %v765_v41, %v285_v37  ;;  %v1210_v44 = vmul.f32 %v765_v41, %v286_v38  ;;  %v715_v45 = vpop.permute.xlu1 %714  ;;  %v710_v47 = vpop.permute.xlu0 %709  ;;  %v127_v41 = vld [vmem:[%s3732_s0 + $0x3a0] sm:$0xff] }
 0x116   :  { %v1189_v48 = vmul.f32 %v715_v45, %v265_v39  ;;  %v1190_v49 = vmul.f32 %v715_v45, %v266_v40  ;;  %v1187_v50 = vmul.f32 %v710_v47, %v263_v42  ;;  %v1188_v52 = vmul.f32 %v710_v47, %v264_v46  ;;  %v309_v45 = vld [vmem:[%s3733_s1 + $0x530] sm:$0xff]  ;;  %v310_v46 = vld [vmem:[%s3733_s1 + $0x538] sm:$0xff] }
 0x117   :  { %1474 = vst [vmem:[%s3734_s2 + $0x470] sm:$0xff] %v1209_v43  ;;  %v126_v43 = vld [vmem:[%s3732_s0 + $0x398] sm:$0xff]  ;;  %v289_v47 = vld [vmem:[%s3733_s1 + $0x490] sm:$0xff] }
 0x118   :  { %1475 = vst.msk [vmem:[%s3734_s2 + $0x478] sm:$0xff] %vm1332_vm0, %v1210_v44  ;;  %v125_v44 = vld [vmem:[%s3732_s0 + $0x390] sm:$0xff] }
 0x119   :  { %1454 = vst [vmem:[%s3734_s2 + $0x3d0] sm:$0xff] %v1189_v48  ;;  %v290_v48 = vld [vmem:[%s3733_s1 + $0x498] sm:$0xff] }
 0x11a   :  { %1455 = vst.msk [vmem:[%s3734_s2 + $0x3d8] sm:$0xff] %vm1332_vm0, %v1190_v49  ;;  %944 = vperm.xlu2 %1603, %v118_v51  }
 0x11b   :  { %1452 = vst [vmem:[%s3734_s2 + $0x3c0] sm:$0xff] %v1187_v50  ;;  %939 = vperm.xlu1 %1602, %v117_v53   ;;  %934 = vperm.xlu0 %1601, %v116_v54   ;;  %v287_v50 = vld [vmem:[%s3733_s1 + $0x480] sm:$0xff]  ;;  %v288_v54 = vld [vmem:[%s3733_s1 + $0x488] sm:$0xff] }
 0x11c   :  { %1453 = vst.msk [vmem:[%s3734_s2 + $0x3c8] sm:$0xff] %vm1332_vm0, %v1188_v52  ;;  %v780_v59 = vpop.permute.xlu2 %779 }
 0x11d   :  { %v1215_v61 = vmul.f32 %v780_v59, %v291_v55  ;;  %v1216_v62 = vmul.f32 %v780_v59, %v292_v56  ;;  %v730_v63 = vpop.permute.xlu1 %729  ;;  %v725_v1 = vpop.permute.xlu0 %724  ;;  %v130_v59 = vld [vmem:[%s3732_s0 + $0x3b8] sm:$0xff] }
 0x11e   :  { %v1195_v2 = vmul.f32 %v730_v63, %v271_v57  ;;  %v1196_v3 = vmul.f32 %v730_v63, %v272_v58  ;;  %v1193_v4 = vmul.f32 %v725_v1, %v269_v60  ;;  %v1194_v6 = vmul.f32 %v725_v1, %v270_v0  ;;  %v315_v63 = vld [vmem:[%s3733_s1 + $0x560] sm:$0xff]  ;;  %v316_v0 = vld [vmem:[%s3733_s1 + $0x568] sm:$0xff] }
 0x11f   :  { %1480 = vst [vmem:[%s3734_s2 + $0x4a0] sm:$0xff] %v1215_v61  ;;  %v129_v61 = vld [vmem:[%s3732_s0 + $0x3b0] sm:$0xff]  ;;  %v295_v1 = vld [vmem:[%s3733_s1 + $0x4c0] sm:$0xff] }
 0x120   :  { %1481 = vst.msk [vmem:[%s3734_s2 + $0x4a8] sm:$0xff] %vm1332_vm0, %v1216_v62  ;;  %v128_v62 = vld [vmem:[%s3732_s0 + $0x3a8] sm:$0xff] }
 0x121   :  { %1460 = vst [vmem:[%s3734_s2 + $0x400] sm:$0xff] %v1195_v2  ;;  %v296_v2 = vld [vmem:[%s3733_s1 + $0x4c8] sm:$0xff] }
 0x122   :  { %1461 = vst.msk [vmem:[%s3734_s2 + $0x408] sm:$0xff] %vm1332_vm0, %v1196_v3  ;;  %959 = vperm.xlu2 %1603, %v121_v5  }
 0x123   :  { %1458 = vst [vmem:[%s3734_s2 + $0x3f0] sm:$0xff] %v1193_v4  ;;  %954 = vperm.xlu1 %1602, %v120_v7   ;;  %949 = vperm.xlu0 %1601, %v119_v8   ;;  %v293_v4 = vld [vmem:[%s3733_s1 + $0x4b0] sm:$0xff]  ;;  %v294_v8 = vld [vmem:[%s3733_s1 + $0x4b8] sm:$0xff] }
 0x124   :  { %1459 = vst.msk [vmem:[%s3734_s2 + $0x3f8] sm:$0xff] %vm1332_vm0, %v1194_v6  ;;  %v795_v13 = vpop.permute.xlu2 %794 }
 0x125   :  { %v1221_v15 = vmul.f32 %v795_v13, %v297_v9  ;;  %v1222_v16 = vmul.f32 %v795_v13, %v298_v10  ;;  %v745_v17 = vpop.permute.xlu1 %744  ;;  %v740_v19 = vpop.permute.xlu0 %739  ;;  %v133_v13 = vld [vmem:[%s3732_s0 + $0x3d0] sm:$0xff] }
 0x126   :  { %v1201_v20 = vmul.f32 %v745_v17, %v277_v11  ;;  %v1202_v21 = vmul.f32 %v745_v17, %v278_v12  ;;  %v1199_v22 = vmul.f32 %v740_v19, %v275_v14  ;;  %v1200_v24 = vmul.f32 %v740_v19, %v276_v18  ;;  %v321_v17 = vld [vmem:[%s3733_s1 + $0x590] sm:$0xff]  ;;  %v322_v18 = vld [vmem:[%s3733_s1 + $0x598] sm:$0xff] }
 0x127   :  { %1486 = vst [vmem:[%s3734_s2 + $0x4d0] sm:$0xff] %v1221_v15  ;;  %v132_v15 = vld [vmem:[%s3732_s0 + $0x3c8] sm:$0xff]  ;;  %v301_v19 = vld [vmem:[%s3733_s1 + $0x4f0] sm:$0xff] }
 0x128   :  { %1487 = vst.msk [vmem:[%s3734_s2 + $0x4d8] sm:$0xff] %vm1332_vm0, %v1222_v16  ;;  %v131_v16 = vld [vmem:[%s3732_s0 + $0x3c0] sm:$0xff] }
 0x129   :  { %1466 = vst [vmem:[%s3734_s2 + $0x430] sm:$0xff] %v1201_v20  ;;  %v302_v20 = vld [vmem:[%s3733_s1 + $0x4f8] sm:$0xff] }
 0x12a   :  { %1467 = vst.msk [vmem:[%s3734_s2 + $0x438] sm:$0xff] %vm1332_vm0, %v1202_v21  ;;  %974 = vperm.xlu2 %1603, %v124_v23  }
 0x12b   :  { %1464 = vst [vmem:[%s3734_s2 + $0x420] sm:$0xff] %v1199_v22  ;;  %969 = vperm.xlu1 %1602, %v123_v25   ;;  %964 = vperm.xlu0 %1601, %v122_v26   ;;  %v299_v22 = vld [vmem:[%s3733_s1 + $0x4e0] sm:$0xff]  ;;  %v300_v26 = vld [vmem:[%s3733_s1 + $0x4e8] sm:$0xff] }
 0x12c   :  { %1465 = vst.msk [vmem:[%s3734_s2 + $0x428] sm:$0xff] %vm1332_vm0, %v1200_v24  ;;  %v810_v31 = vpop.permute.xlu2 %809 }
 0x12d   :  { %v1227_v33 = vmul.f32 %v810_v31, %v303_v27  ;;  %v1228_v34 = vmul.f32 %v810_v31, %v304_v28  ;;  %v760_v35 = vpop.permute.xlu1 %759  ;;  %v755_v37 = vpop.permute.xlu0 %754  ;;  %v136_v31 = vld [vmem:[%s3732_s0 + $0x3e8] sm:$0xff] }
 0x12e   :  { %v1207_v38 = vmul.f32 %v760_v35, %v283_v29  ;;  %v1208_v39 = vmul.f32 %v760_v35, %v284_v30  ;;  %v1205_v40 = vmul.f32 %v755_v37, %v281_v32  ;;  %v1206_v42 = vmul.f32 %v755_v37, %v282_v36  ;;  %v327_v35 = vld [vmem:[%s3733_s1 + $0x5c0] sm:$0xff]  ;;  %v328_v36 = vld [vmem:[%s3733_s1 + $0x5c8] sm:$0xff] }
 0x12f   :  { %1492 = vst [vmem:[%s3734_s2 + $0x500] sm:$0xff] %v1227_v33  ;;  %v135_v33 = vld [vmem:[%s3732_s0 + $0x3e0] sm:$0xff] }
 0x130   :  { %1493 = vst.msk [vmem:[%s3734_s2 + $0x508] sm:$0xff] %vm1332_vm0, %v1228_v34  ;;  %v134_v34 = vld [vmem:[%s3732_s0 + $0x3d8] sm:$0xff]  ;;  %v307_v37 = vld [vmem:[%s3733_s1 + $0x520] sm:$0xff] }
 0x131   :  { %1472 = vst [vmem:[%s3734_s2 + $0x460] sm:$0xff] %v1207_v38  ;;  %v308_v38 = vld [vmem:[%s3733_s1 + $0x528] sm:$0xff] }
 0x132   :  { %1473 = vst.msk [vmem:[%s3734_s2 + $0x468] sm:$0xff] %vm1332_vm0, %v1208_v39  ;;  %989 = vperm.xlu2 %1603, %v127_v41  }
 0x133   :  { %1470 = vst [vmem:[%s3734_s2 + $0x450] sm:$0xff] %v1205_v40  ;;  %984 = vperm.xlu1 %1602, %v126_v43   ;;  %979 = vperm.xlu0 %1601, %v125_v44   ;;  %v305_v40 = vld [vmem:[%s3733_s1 + $0x510] sm:$0xff]  ;;  %v306_v44 = vld [vmem:[%s3733_s1 + $0x518] sm:$0xff] }
 0x134   :  { %1471 = vst.msk [vmem:[%s3734_s2 + $0x458] sm:$0xff] %vm1332_vm0, %v1206_v42  ;;  %v825_v49 = vpop.permute.xlu2 %824 }
 0x135   :  { %v1233_v51 = vmul.f32 %v825_v49, %v309_v45  ;;  %v1234_v52 = vmul.f32 %v825_v49, %v310_v46  ;;  %v775_v53 = vpop.permute.xlu1 %774  ;;  %v770_v55 = vpop.permute.xlu0 %769  ;;  %v139_v49 = vld [vmem:[%s3732_s0 + $0x400] sm:$0xff] }
 0x136   :  { %v1213_v56 = vmul.f32 %v775_v53, %v289_v47  ;;  %v1214_v57 = vmul.f32 %v775_v53, %v290_v48  ;;  %v1211_v58 = vmul.f32 %v770_v55, %v287_v50  ;;  %v1212_v60 = vmul.f32 %v770_v55, %v288_v54  ;;  %v333_v53 = vld [vmem:[%s3733_s1 + $0x5f0] sm:$0xff]  ;;  %v334_v54 = vld [vmem:[%s3733_s1 + $0x5f8] sm:$0xff] }
 0x137   :  { %1498 = vst [vmem:[%s3734_s2 + $0x530] sm:$0xff] %v1233_v51  ;;  %v138_v51 = vld [vmem:[%s3732_s0 + $0x3f8] sm:$0xff]  ;;  %v313_v55 = vld [vmem:[%s3733_s1 + $0x550] sm:$0xff] }
 0x138   :  { %1499 = vst.msk [vmem:[%s3734_s2 + $0x538] sm:$0xff] %vm1332_vm0, %v1234_v52  ;;  %v137_v52 = vld [vmem:[%s3732_s0 + $0x3f0] sm:$0xff] }
 0x139   :  { %1478 = vst [vmem:[%s3734_s2 + $0x490] sm:$0xff] %v1213_v56  ;;  %v314_v56 = vld [vmem:[%s3733_s1 + $0x558] sm:$0xff] }
 0x13a   :  { %1479 = vst.msk [vmem:[%s3734_s2 + $0x498] sm:$0xff] %vm1332_vm0, %v1214_v57  ;;  %1004 = vperm.xlu2 %1603, %v130_v59  }
 0x13b   :  { %1476 = vst [vmem:[%s3734_s2 + $0x480] sm:$0xff] %v1211_v58  ;;  %999 = vperm.xlu1 %1602, %v129_v61   ;;  %994 = vperm.xlu0 %1601, %v128_v62   ;;  %v311_v58 = vld [vmem:[%s3733_s1 + $0x540] sm:$0xff]  ;;  %v312_v62 = vld [vmem:[%s3733_s1 + $0x548] sm:$0xff] }
 0x13c   :  { %1477 = vst.msk [vmem:[%s3734_s2 + $0x488] sm:$0xff] %vm1332_vm0, %v1212_v60  ;;  %v840_v3 = vpop.permute.xlu2 %839 }
 0x13d   :  { %v1239_v5 = vmul.f32 %v840_v3, %v315_v63  ;;  %v1240_v6 = vmul.f32 %v840_v3, %v316_v0  ;;  %v790_v7 = vpop.permute.xlu1 %789  ;;  %v785_v9 = vpop.permute.xlu0 %784  ;;  %v142_v3 = vld [vmem:[%s3732_s0 + $0x418] sm:$0xff] }
 0x13e   :  { %v1219_v10 = vmul.f32 %v790_v7, %v295_v1  ;;  %v1220_v11 = vmul.f32 %v790_v7, %v296_v2  ;;  %v1217_v12 = vmul.f32 %v785_v9, %v293_v4  ;;  %v1218_v14 = vmul.f32 %v785_v9, %v294_v8  ;;  %v339_v7 = vld [vmem:[%s3733_s1 + $0x620] sm:$0xff]  ;;  %v340_v8 = vld [vmem:[%s3733_s1 + $0x628] sm:$0xff] }
 0x13f   :  { %1504 = vst [vmem:[%s3734_s2 + $0x560] sm:$0xff] %v1239_v5  ;;  %v141_v5 = vld [vmem:[%s3732_s0 + $0x410] sm:$0xff]  ;;  %v319_v9 = vld [vmem:[%s3733_s1 + $0x580] sm:$0xff] }
 0x140   :  { %1505 = vst.msk [vmem:[%s3734_s2 + $0x568] sm:$0xff] %vm1332_vm0, %v1240_v6  ;;  %v140_v6 = vld [vmem:[%s3732_s0 + $0x408] sm:$0xff] }
 0x141   :  { %1484 = vst [vmem:[%s3734_s2 + $0x4c0] sm:$0xff] %v1219_v10  ;;  %v320_v10 = vld [vmem:[%s3733_s1 + $0x588] sm:$0xff] }
 0x142   :  { %1485 = vst.msk [vmem:[%s3734_s2 + $0x4c8] sm:$0xff] %vm1332_vm0, %v1220_v11  ;;  %1019 = vperm.xlu2 %1603, %v133_v13  }
 0x143   :  { %1482 = vst [vmem:[%s3734_s2 + $0x4b0] sm:$0xff] %v1217_v12  ;;  %1014 = vperm.xlu1 %1602, %v132_v15   ;;  %1009 = vperm.xlu0 %1601, %v131_v16   ;;  %v317_v12 = vld [vmem:[%s3733_s1 + $0x570] sm:$0xff]  ;;  %v318_v16 = vld [vmem:[%s3733_s1 + $0x578] sm:$0xff] }
 0x144   :  { %1483 = vst.msk [vmem:[%s3734_s2 + $0x4b8] sm:$0xff] %vm1332_vm0, %v1218_v14  ;;  %v855_v21 = vpop.permute.xlu2 %854 }
 0x145   :  { %v1245_v23 = vmul.f32 %v855_v21, %v321_v17  ;;  %v1246_v24 = vmul.f32 %v855_v21, %v322_v18  ;;  %v805_v25 = vpop.permute.xlu1 %804  ;;  %v800_v27 = vpop.permute.xlu0 %799 }
 0x146   :  { %v1225_v28 = vmul.f32 %v805_v25, %v301_v19  ;;  %v1226_v29 = vmul.f32 %v805_v25, %v302_v20  ;;  %v1223_v30 = vmul.f32 %v800_v27, %v299_v22  ;;  %v1224_v32 = vmul.f32 %v800_v27, %v300_v26  ;;  %v345_v22 = vld [vmem:[%s3733_s1 + $0x650] sm:$0xff]  ;;  %v326_v25 = vld [vmem:[%s3733_s1 + $0x5b8] sm:$0xff]  ;;  %v323_v27 = vld [vmem:[%s3733_s1 + $0x5a0] sm:$0xff] }
 0x147   :  { %1510 = vst [vmem:[%s3734_s2 + $0x590] sm:$0xff] %v1245_v23  ;;  %v346_v23 = vld [vmem:[%s3733_s1 + $0x658] sm:$0xff] }
 0x148   :  { %1511 = vst.msk [vmem:[%s3734_s2 + $0x598] sm:$0xff] %vm1332_vm0, %v1246_v24  ;;  %v325_v24 = vld [vmem:[%s3733_s1 + $0x5b0] sm:$0xff] }
 0x149   :  { %1490 = vst [vmem:[%s3734_s2 + $0x4f0] sm:$0xff] %v1225_v28 }
 0x14a   :  { %1491 = vst.msk [vmem:[%s3734_s2 + $0x4f8] sm:$0xff] %vm1332_vm0, %v1226_v29  ;;  %1034 = vperm.xlu2 %1603, %v136_v31   ;;  %v324_v31 = vld [vmem:[%s3733_s1 + $0x5a8] sm:$0xff] }
 0x14b   :  { %1488 = vst [vmem:[%s3734_s2 + $0x4e0] sm:$0xff] %v1223_v30  ;;  %1029 = vperm.xlu1 %1602, %v135_v33   ;;  %1024 = vperm.xlu0 %1601, %v134_v34  }
 0x14c   :  { %1489 = vst.msk [vmem:[%s3734_s2 + $0x4e8] sm:$0xff] %vm1332_vm0, %v1224_v32  ;;  %v870_v39 = vpop.permute.xlu2 %869 }
 0x14d   :  { %v1251_v41 = vmul.f32 %v870_v39, %v327_v35  ;;  %v1252_v42 = vmul.f32 %v870_v39, %v328_v36  ;;  %v820_v43 = vpop.permute.xlu1 %819  ;;  %v815_v45 = vpop.permute.xlu0 %814  ;;  %v331_v39 = vld [vmem:[%s3733_s1 + $0x5e0] sm:$0xff] }
 0x14e   :  { %v1231_v46 = vmul.f32 %v820_v43, %v307_v37  ;;  %v1232_v47 = vmul.f32 %v820_v43, %v308_v38  ;;  %v1229_v48 = vmul.f32 %v815_v45, %v305_v40  ;;  %v1230_v50 = vmul.f32 %v815_v45, %v306_v44  ;;  %v351_v37 = vld [vmem:[%s3733_s1 + $0x680] sm:$0xff]  ;;  %v352_v38 = vld [vmem:[%s3733_s1 + $0x688] sm:$0xff] }
 0x14f   :  { %1516 = vst [vmem:[%s3734_s2 + $0x5c0] sm:$0xff] %v1251_v41  ;;  %v332_v40 = vld [vmem:[%s3733_s1 + $0x5e8] sm:$0xff] }
 0x150   :  { %1517 = vst.msk [vmem:[%s3734_s2 + $0x5c8] sm:$0xff] %vm1332_vm0, %v1252_v42  ;;  %v329_v42 = vld [vmem:[%s3733_s1 + $0x5d0] sm:$0xff] }
 0x151   :  { %1496 = vst [vmem:[%s3734_s2 + $0x520] sm:$0xff] %v1231_v46  ;;  %v330_v46 = vld [vmem:[%s3733_s1 + $0x5d8] sm:$0xff] }
 0x152   :  { %1497 = vst.msk [vmem:[%s3734_s2 + $0x528] sm:$0xff] %vm1332_vm0, %v1232_v47  ;;  %1049 = vperm.xlu2 %1603, %v139_v49  }
 0x153   :  { %1494 = vst [vmem:[%s3734_s2 + $0x510] sm:$0xff] %v1229_v48  ;;  %1044 = vperm.xlu1 %1602, %v138_v51   ;;  %1039 = vperm.xlu0 %1601, %v137_v52   ;;  %v357_v52 = vld [vmem:[%s3733_s1 + $0x6b0] sm:$0xff] }
 0x154   :  { %1495 = vst.msk [vmem:[%s3734_s2 + $0x518] sm:$0xff] %vm1332_vm0, %v1230_v50  ;;  %v885_v57 = vpop.permute.xlu2 %884 }
 0x155   :  { %v1257_v59 = vmul.f32 %v885_v57, %v333_v53  ;;  %v1258_v60 = vmul.f32 %v885_v57, %v334_v54  ;;  %v835_v61 = vpop.permute.xlu1 %834  ;;  %v830_v63 = vpop.permute.xlu0 %829  ;;  %v358_v53 = vld [vmem:[%s3733_s1 + $0x6b8] sm:$0xff]  ;;  %v337_v54 = vld [vmem:[%s3733_s1 + $0x610] sm:$0xff]  ;;  %v335_v57 = vld [vmem:[%s3733_s1 + $0x600] sm:$0xff] }
 0x156   :  { %v1237_v0 = vmul.f32 %v835_v61, %v313_v55  ;;  %v1238_v1 = vmul.f32 %v835_v61, %v314_v56  ;;  %v1235_v2 = vmul.f32 %v830_v63, %v311_v58  ;;  %v1236_v4 = vmul.f32 %v830_v63, %v312_v62  ;;  %v338_v55 = vld [vmem:[%s3733_s1 + $0x618] sm:$0xff]  ;;  %v336_v61 = vld [vmem:[%s3733_s1 + $0x608] sm:$0xff] }
 0x157   :  { %1522 = vst [vmem:[%s3734_s2 + $0x5f0] sm:$0xff] %v1257_v59 }
 0x158   :  { %1523 = vst.msk [vmem:[%s3734_s2 + $0x5f8] sm:$0xff] %vm1332_vm0, %v1258_v60 }
 0x159   :  { %1502 = vst [vmem:[%s3734_s2 + $0x550] sm:$0xff] %v1237_v0 }
 0x15a   :  { %1503 = vst.msk [vmem:[%s3734_s2 + $0x558] sm:$0xff] %vm1332_vm0, %v1238_v1  ;;  %1064 = vperm.xlu2 %1603, %v142_v3   ;;  %v363_v3 = vld [vmem:[%s3733_s1 + $0x6e0] sm:$0xff] }
 0x15b   :  { %1500 = vst [vmem:[%s3734_s2 + $0x540] sm:$0xff] %v1235_v2  ;;  %1059 = vperm.xlu1 %1602, %v141_v5   ;;  %1054 = vperm.xlu0 %1601, %v140_v6   ;;  %v343_v5 = vld [vmem:[%s3733_s1 + $0x640] sm:$0xff]  ;;  %v344_v6 = vld [vmem:[%s3733_s1 + $0x648] sm:$0xff] }
 0x15c   :  { %1501 = vst.msk [vmem:[%s3734_s2 + $0x548] sm:$0xff] %vm1332_vm0, %v1236_v4  ;;  %v900_v11 = vpop.permute.xlu2 %899  ;;  %v364_v4 = vld [vmem:[%s3733_s1 + $0x6e8] sm:$0xff] }
 0x15d   :  { %v1263_v13 = vmul.f32 %v900_v11, %v339_v7  ;;  %v1264_v14 = vmul.f32 %v900_v11, %v340_v8  ;;  %v850_v15 = vpop.permute.xlu1 %849  ;;  %v845_v17 = vpop.permute.xlu0 %844  ;;  %v341_v8 = vld [vmem:[%s3733_s1 + $0x630] sm:$0xff] }
 0x15e   :  { %v1243_v18 = vmul.f32 %v850_v15, %v319_v9  ;;  %v1244_v19 = vmul.f32 %v850_v15, %v320_v10  ;;  %v1241_v20 = vmul.f32 %v845_v17, %v317_v12  ;;  %v1242_v21 = vmul.f32 %v845_v17, %v318_v16  ;;  %v342_v12 = vld [vmem:[%s3733_s1 + $0x638] sm:$0xff] }
 0x15f   :  { %1528 = vst [vmem:[%s3734_s2 + $0x620] sm:$0xff] %v1263_v13 }
 0x160   :  { %1529 = vst.msk [vmem:[%s3734_s2 + $0x628] sm:$0xff] %vm1332_vm0, %v1264_v14 }
 0x161   :  { %1508 = vst [vmem:[%s3734_s2 + $0x580] sm:$0xff] %v1243_v18  ;;  %v369_v18 = vld [vmem:[%s3733_s1 + $0x710] sm:$0xff] }
 0x162   :  { %1509 = vst.msk [vmem:[%s3734_s2 + $0x588] sm:$0xff] %vm1332_vm0, %v1244_v19  ;;  %v370_v19 = vld [vmem:[%s3733_s1 + $0x718] sm:$0xff] }
 0x163   :  { %1506 = vst [vmem:[%s3734_s2 + $0x570] sm:$0xff] %v1241_v20  ;;  %v349_v20 = vld [vmem:[%s3733_s1 + $0x670] sm:$0xff] }
 0x164   :  { %1507 = vst.msk [vmem:[%s3734_s2 + $0x578] sm:$0xff] %vm1332_vm0, %v1242_v21  ;;  %v915_v26 = vpop.permute.xlu2 %914  ;;  %v350_v21 = vld [vmem:[%s3733_s1 + $0x678] sm:$0xff] }
 0x165   :  { %v1269_v28 = vmul.f32 %v915_v26, %v345_v22  ;;  %v1270_v29 = vmul.f32 %v915_v26, %v346_v23  ;;  %v865_v30 = vpop.permute.xlu1 %864  ;;  %v860_v32 = vpop.permute.xlu0 %859  ;;  %v347_v23 = vld [vmem:[%s3733_s1 + $0x660] sm:$0xff] }
 0x166   :  { %v1249_v33 = vmul.f32 %v865_v30, %v325_v24  ;;  %v1250_v34 = vmul.f32 %v865_v30, %v326_v25  ;;  %v1247_v35 = vmul.f32 %v860_v32, %v323_v27  ;;  %v1248_v36 = vmul.f32 %v860_v32, %v324_v31  ;;  %v348_v27 = vld [vmem:[%s3733_s1 + $0x668] sm:$0xff] }
 0x167   :  { %1534 = vst [vmem:[%s3734_s2 + $0x650] sm:$0xff] %v1269_v28 }
 0x168   :  { %1535 = vst.msk [vmem:[%s3734_s2 + $0x658] sm:$0xff] %vm1332_vm0, %v1270_v29 }
 0x169   :  { %1514 = vst [vmem:[%s3734_s2 + $0x5b0] sm:$0xff] %v1249_v33  ;;  %v375_v33 = vld [vmem:[%s3733_s1 + $0x740] sm:$0xff] }
 0x16a   :  { %1515 = vst.msk [vmem:[%s3734_s2 + $0x5b8] sm:$0xff] %vm1332_vm0, %v1250_v34  ;;  %v376_v34 = vld [vmem:[%s3733_s1 + $0x748] sm:$0xff] }
 0x16b   :  { %1512 = vst [vmem:[%s3734_s2 + $0x5a0] sm:$0xff] %v1247_v35  ;;  %v355_v35 = vld [vmem:[%s3733_s1 + $0x6a0] sm:$0xff] }
 0x16c   :  { %1513 = vst.msk [vmem:[%s3734_s2 + $0x5a8] sm:$0xff] %vm1332_vm0, %v1248_v36  ;;  %v930_v41 = vpop.permute.xlu2 %929  ;;  %v356_v36 = vld [vmem:[%s3733_s1 + $0x6a8] sm:$0xff] }
 0x16d   :  { %v1275_v43 = vmul.f32 %v930_v41, %v351_v37  ;;  %v1276_v44 = vmul.f32 %v930_v41, %v352_v38  ;;  %v880_v45 = vpop.permute.xlu1 %879  ;;  %v875_v47 = vpop.permute.xlu0 %874  ;;  %v353_v38 = vld [vmem:[%s3733_s1 + $0x690] sm:$0xff] }
 0x16e   :  { %v1255_v48 = vmul.f32 %v880_v45, %v331_v39  ;;  %v1256_v49 = vmul.f32 %v880_v45, %v332_v40  ;;  %v1253_v50 = vmul.f32 %v875_v47, %v329_v42  ;;  %v1254_v51 = vmul.f32 %v875_v47, %v330_v46  ;;  %v354_v42 = vld [vmem:[%s3733_s1 + $0x698] sm:$0xff] }
 0x16f   :  { %1540 = vst [vmem:[%s3734_s2 + $0x680] sm:$0xff] %v1275_v43 }
 0x170   :  { %1541 = vst.msk [vmem:[%s3734_s2 + $0x688] sm:$0xff] %vm1332_vm0, %v1276_v44 }
 0x171   :  { %1520 = vst [vmem:[%s3734_s2 + $0x5e0] sm:$0xff] %v1255_v48  ;;  %v381_v48 = vld [vmem:[%s3733_s1 + $0x770] sm:$0xff] }
 0x172   :  { %1521 = vst.msk [vmem:[%s3734_s2 + $0x5e8] sm:$0xff] %vm1332_vm0, %v1256_v49  ;;  %v382_v49 = vld [vmem:[%s3733_s1 + $0x778] sm:$0xff] }
 0x173   :  { %1518 = vst [vmem:[%s3734_s2 + $0x5d0] sm:$0xff] %v1253_v50  ;;  %v361_v50 = vld [vmem:[%s3733_s1 + $0x6d0] sm:$0xff] }
 0x174   :  { %1519 = vst.msk [vmem:[%s3734_s2 + $0x5d8] sm:$0xff] %vm1332_vm0, %v1254_v51  ;;  %v945_v56 = vpop.permute.xlu2 %944  ;;  %v362_v51 = vld [vmem:[%s3733_s1 + $0x6d8] sm:$0xff] }
 0x175   :  { %v1281_v58 = vmul.f32 %v945_v56, %v357_v52  ;;  %v1282_v59 = vmul.f32 %v945_v56, %v358_v53  ;;  %v895_v60 = vpop.permute.xlu1 %894  ;;  %v890_v62 = vpop.permute.xlu0 %889  ;;  %v359_v53 = vld [vmem:[%s3733_s1 + $0x6c0] sm:$0xff] }
 0x176   :  { %v1261_v63 = vmul.f32 %v895_v60, %v337_v54  ;;  %v1262_v0 = vmul.f32 %v895_v60, %v338_v55  ;;  %v1259_v1 = vmul.f32 %v890_v62, %v335_v57  ;;  %v1260_v2 = vmul.f32 %v890_v62, %v336_v61  ;;  %v360_v57 = vld [vmem:[%s3733_s1 + $0x6c8] sm:$0xff] }
 0x177   :  { %1546 = vst [vmem:[%s3734_s2 + $0x6b0] sm:$0xff] %v1281_v58 }
 0x178   :  { %1547 = vst.msk [vmem:[%s3734_s2 + $0x6b8] sm:$0xff] %vm1332_vm0, %v1282_v59 }
 0x179   :  { %1526 = vst [vmem:[%s3734_s2 + $0x610] sm:$0xff] %v1261_v63  ;;  %v387_v63 = vld [vmem:[%s3733_s1 + $0x7a0] sm:$0xff] }
 0x17a   :  { %1527 = vst.msk [vmem:[%s3734_s2 + $0x618] sm:$0xff] %vm1332_vm0, %v1262_v0  ;;  %v388_v0 = vld [vmem:[%s3733_s1 + $0x7a8] sm:$0xff] }
 0x17b   :  { %1524 = vst [vmem:[%s3734_s2 + $0x600] sm:$0xff] %v1259_v1  ;;  %v367_v1 = vld [vmem:[%s3733_s1 + $0x700] sm:$0xff] }
 0x17c   :  { %1525 = vst.msk [vmem:[%s3734_s2 + $0x608] sm:$0xff] %vm1332_vm0, %v1260_v2  ;;  %v960_v7 = vpop.permute.xlu2 %959  ;;  %v368_v2 = vld [vmem:[%s3733_s1 + $0x708] sm:$0xff] }
 0x17d   :  { %v1287_v9 = vmul.f32 %v960_v7, %v363_v3  ;;  %v1288_v10 = vmul.f32 %v960_v7, %v364_v4  ;;  %v910_v11 = vpop.permute.xlu1 %909  ;;  %v905_v13 = vpop.permute.xlu0 %904  ;;  %v365_v4 = vld [vmem:[%s3733_s1 + $0x6f0] sm:$0xff] }
 0x17e   :  { %v1267_v14 = vmul.f32 %v910_v11, %v343_v5  ;;  %v1268_v15 = vmul.f32 %v910_v11, %v344_v6  ;;  %v1265_v16 = vmul.f32 %v905_v13, %v341_v8  ;;  %v1266_v17 = vmul.f32 %v905_v13, %v342_v12  ;;  %v366_v8 = vld [vmem:[%s3733_s1 + $0x6f8] sm:$0xff] }
 0x17f   :  { %1552 = vst [vmem:[%s3734_s2 + $0x6e0] sm:$0xff] %v1287_v9 }
 0x180   :  { %1553 = vst.msk [vmem:[%s3734_s2 + $0x6e8] sm:$0xff] %vm1332_vm0, %v1288_v10 }
 0x181   :  { %1532 = vst [vmem:[%s3734_s2 + $0x640] sm:$0xff] %v1267_v14  ;;  %v393_v14 = vld [vmem:[%s3733_s1 + $0x7d0] sm:$0xff] }
 0x182   :  { %1533 = vst.msk [vmem:[%s3734_s2 + $0x648] sm:$0xff] %vm1332_vm0, %v1268_v15  ;;  %v394_v15 = vld [vmem:[%s3733_s1 + $0x7d8] sm:$0xff] }
 0x183   :  { %1530 = vst [vmem:[%s3734_s2 + $0x630] sm:$0xff] %v1265_v16  ;;  %v373_v16 = vld [vmem:[%s3733_s1 + $0x730] sm:$0xff] }
 0x184   :  { %1531 = vst.msk [vmem:[%s3734_s2 + $0x638] sm:$0xff] %vm1332_vm0, %v1266_v17  ;;  %v975_v22 = vpop.permute.xlu2 %974  ;;  %v374_v17 = vld [vmem:[%s3733_s1 + $0x738] sm:$0xff] }
 0x185   :  { %v1293_v24 = vmul.f32 %v975_v22, %v369_v18  ;;  %v1294_v25 = vmul.f32 %v975_v22, %v370_v19  ;;  %v925_v26 = vpop.permute.xlu1 %924  ;;  %v920_v28 = vpop.permute.xlu0 %919  ;;  %v371_v19 = vld [vmem:[%s3733_s1 + $0x720] sm:$0xff] }
 0x186   :  { %v1273_v29 = vmul.f32 %v925_v26, %v349_v20  ;;  %v1274_v30 = vmul.f32 %v925_v26, %v350_v21  ;;  %v1271_v31 = vmul.f32 %v920_v28, %v347_v23  ;;  %v1272_v32 = vmul.f32 %v920_v28, %v348_v27  ;;  %v372_v23 = vld [vmem:[%s3733_s1 + $0x728] sm:$0xff] }
 0x187   :  { %1558 = vst [vmem:[%s3734_s2 + $0x710] sm:$0xff] %v1293_v24 }
 0x188   :  { %1559 = vst.msk [vmem:[%s3734_s2 + $0x718] sm:$0xff] %vm1332_vm0, %v1294_v25 }
 0x189   :  { %1538 = vst [vmem:[%s3734_s2 + $0x670] sm:$0xff] %v1273_v29  ;;  %v399_v29 = vld [vmem:[%s3733_s1 + $0x800] sm:$0xff] }
 0x18a   :  { %1539 = vst.msk [vmem:[%s3734_s2 + $0x678] sm:$0xff] %vm1332_vm0, %v1274_v30  ;;  %v400_v30 = vld [vmem:[%s3733_s1 + $0x808] sm:$0xff] }
 0x18b   :  { %1536 = vst [vmem:[%s3734_s2 + $0x660] sm:$0xff] %v1271_v31  ;;  %v379_v31 = vld [vmem:[%s3733_s1 + $0x760] sm:$0xff] }
 0x18c   :  { %1537 = vst.msk [vmem:[%s3734_s2 + $0x668] sm:$0xff] %vm1332_vm0, %v1272_v32  ;;  %v990_v37 = vpop.permute.xlu2 %989  ;;  %v380_v32 = vld [vmem:[%s3733_s1 + $0x768] sm:$0xff] }
 0x18d   :  { %v1299_v39 = vmul.f32 %v990_v37, %v375_v33  ;;  %v1300_v40 = vmul.f32 %v990_v37, %v376_v34  ;;  %v940_v41 = vpop.permute.xlu1 %939  ;;  %v935_v43 = vpop.permute.xlu0 %934  ;;  %v377_v34 = vld [vmem:[%s3733_s1 + $0x750] sm:$0xff] }
 0x18e   :  { %v1279_v44 = vmul.f32 %v940_v41, %v355_v35  ;;  %v1280_v45 = vmul.f32 %v940_v41, %v356_v36  ;;  %v1277_v46 = vmul.f32 %v935_v43, %v353_v38  ;;  %v1278_v47 = vmul.f32 %v935_v43, %v354_v42  ;;  %v378_v38 = vld [vmem:[%s3733_s1 + $0x758] sm:$0xff] }
 0x18f   :  { %1564 = vst [vmem:[%s3734_s2 + $0x740] sm:$0xff] %v1299_v39 }
 0x190   :  { %1565 = vst.msk [vmem:[%s3734_s2 + $0x748] sm:$0xff] %vm1332_vm0, %v1300_v40 }
 0x191   :  { %1544 = vst [vmem:[%s3734_s2 + $0x6a0] sm:$0xff] %v1279_v44  ;;  %v405_v44 = vld [vmem:[%s3733_s1 + $0x830] sm:$0xff] }
 0x192   :  { %1545 = vst.msk [vmem:[%s3734_s2 + $0x6a8] sm:$0xff] %vm1332_vm0, %v1280_v45  ;;  %v406_v45 = vld [vmem:[%s3733_s1 + $0x838] sm:$0xff] }
 0x193   :  { %1542 = vst [vmem:[%s3734_s2 + $0x690] sm:$0xff] %v1277_v46  ;;  %v385_v46 = vld [vmem:[%s3733_s1 + $0x790] sm:$0xff] }
 0x194   :  { %1543 = vst.msk [vmem:[%s3734_s2 + $0x698] sm:$0xff] %vm1332_vm0, %v1278_v47  ;;  %v1005_v52 = vpop.permute.xlu2 %1004  ;;  %v386_v47 = vld [vmem:[%s3733_s1 + $0x798] sm:$0xff] }
 0x195   :  { %v1305_v54 = vmul.f32 %v1005_v52, %v381_v48  ;;  %v1306_v55 = vmul.f32 %v1005_v52, %v382_v49  ;;  %v955_v56 = vpop.permute.xlu1 %954  ;;  %v950_v58 = vpop.permute.xlu0 %949  ;;  %v383_v49 = vld [vmem:[%s3733_s1 + $0x780] sm:$0xff] }
 0x196   :  { %v1285_v59 = vmul.f32 %v955_v56, %v361_v50  ;;  %v1286_v60 = vmul.f32 %v955_v56, %v362_v51  ;;  %v1283_v61 = vmul.f32 %v950_v58, %v359_v53  ;;  %v1284_v62 = vmul.f32 %v950_v58, %v360_v57  ;;  %v384_v53 = vld [vmem:[%s3733_s1 + $0x788] sm:$0xff] }
 0x197   :  { %1570 = vst [vmem:[%s3734_s2 + $0x770] sm:$0xff] %v1305_v54 }
 0x198   :  { %1571 = vst.msk [vmem:[%s3734_s2 + $0x778] sm:$0xff] %vm1332_vm0, %v1306_v55 }
 0x199   :  { %1550 = vst [vmem:[%s3734_s2 + $0x6d0] sm:$0xff] %v1285_v59  ;;  %v391_v59 = vld [vmem:[%s3733_s1 + $0x7c0] sm:$0xff] }
 0x19a   :  { %1551 = vst.msk [vmem:[%s3734_s2 + $0x6d8] sm:$0xff] %vm1332_vm0, %v1286_v60  ;;  %v392_v60 = vld [vmem:[%s3733_s1 + $0x7c8] sm:$0xff] }
 0x19b   :  { %1548 = vst [vmem:[%s3734_s2 + $0x6c0] sm:$0xff] %v1283_v61  ;;  %v389_v61 = vld [vmem:[%s3733_s1 + $0x7b0] sm:$0xff] }
 0x19c   :  { %1549 = vst.msk [vmem:[%s3734_s2 + $0x6c8] sm:$0xff] %vm1332_vm0, %v1284_v62  ;;  %v1020_v3 = vpop.permute.xlu2 %1019  ;;  %v390_v62 = vld [vmem:[%s3733_s1 + $0x7b8] sm:$0xff] }
 0x19d   :  { %v1311_v5 = vmul.f32 %v1020_v3, %v387_v63  ;;  %v1312_v6 = vmul.f32 %v1020_v3, %v388_v0  ;;  %v970_v7 = vpop.permute.xlu1 %969  ;;  %v965_v9 = vpop.permute.xlu0 %964 }
 0x19e   :  { %v1291_v10 = vmul.f32 %v970_v7, %v367_v1  ;;  %v1292_v11 = vmul.f32 %v970_v7, %v368_v2  ;;  %v1289_v12 = vmul.f32 %v965_v9, %v365_v4  ;;  %v1290_v13 = vmul.f32 %v965_v9, %v366_v8  ;;  %v395_v7 = vld [vmem:[%s3733_s1 + $0x7e0] sm:$0xff]  ;;  %v396_v8 = vld [vmem:[%s3733_s1 + $0x7e8] sm:$0xff] }
 0x19f   :  { %1576 = vst [vmem:[%s3734_s2 + $0x7a0] sm:$0xff] %v1311_v5  ;;  %v397_v5 = vld [vmem:[%s3733_s1 + $0x7f0] sm:$0xff] }
 0x1a0   :  { %1577 = vst.msk [vmem:[%s3734_s2 + $0x7a8] sm:$0xff] %vm1332_vm0, %v1312_v6  ;;  %v398_v6 = vld [vmem:[%s3733_s1 + $0x7f8] sm:$0xff] }
 0x1a1   :  { %1556 = vst [vmem:[%s3734_s2 + $0x700] sm:$0xff] %v1291_v10 }
 0x1a2   :  { %1557 = vst.msk [vmem:[%s3734_s2 + $0x708] sm:$0xff] %vm1332_vm0, %v1292_v11 }
 0x1a3   :  { %1554 = vst [vmem:[%s3734_s2 + $0x6f0] sm:$0xff] %v1289_v12 }
 0x1a4   :  { %1555 = vst.msk [vmem:[%s3734_s2 + $0x6f8] sm:$0xff] %vm1332_vm0, %v1290_v13  ;;  %v1035_v18 = vpop.permute.xlu2 %1034 }
 0x1a5   :  { %v1317_v20 = vmul.f32 %v1035_v18, %v393_v14  ;;  %v1318_v21 = vmul.f32 %v1035_v18, %v394_v15  ;;  %v985_v22 = vpop.permute.xlu1 %984  ;;  %v980_v24 = vpop.permute.xlu0 %979  ;;  %v403_v15 = vld [vmem:[%s3733_s1 + $0x820] sm:$0xff]  ;;  %v402_v18 = vld [vmem:[%s3733_s1 + $0x818] sm:$0xff] }
 0x1a6   :  { %v1297_v25 = vmul.f32 %v985_v22, %v373_v16  ;;  %v1298_v26 = vmul.f32 %v985_v22, %v374_v17  ;;  %v1295_v27 = vmul.f32 %v980_v24, %v371_v19  ;;  %v1296_v28 = vmul.f32 %v980_v24, %v372_v23  ;;  %v404_v16 = vld [vmem:[%s3733_s1 + $0x828] sm:$0xff]  ;;  %v401_v17 = vld [vmem:[%s3733_s1 + $0x810] sm:$0xff] }
 0x1a7   :  { %1582 = vst [vmem:[%s3734_s2 + $0x7d0] sm:$0xff] %v1317_v20 }
 0x1a8   :  { %1583 = vst.msk [vmem:[%s3734_s2 + $0x7d8] sm:$0xff] %vm1332_vm0, %v1318_v21 }
 0x1a9   :  { %1562 = vst [vmem:[%s3734_s2 + $0x730] sm:$0xff] %v1297_v25 }
 0x1aa   :  { %1563 = vst.msk [vmem:[%s3734_s2 + $0x738] sm:$0xff] %vm1332_vm0, %v1298_v26 }
 0x1ab   :  { %1560 = vst [vmem:[%s3734_s2 + $0x720] sm:$0xff] %v1295_v27 }
 0x1ac   :  { %1561 = vst.msk [vmem:[%s3734_s2 + $0x728] sm:$0xff] %vm1332_vm0, %v1296_v28  ;;  %v1050_v33 = vpop.permute.xlu2 %1049 }
 0x1ad   :  { %v1323_v35 = vmul.f32 %v1050_v33, %v399_v29  ;;  %v1324_v36 = vmul.f32 %v1050_v33, %v400_v30  ;;  %v1000_v37 = vpop.permute.xlu1 %999  ;;  %v995_v39 = vpop.permute.xlu0 %994 }
 0x1ae   :  { %v1303_v40 = vmul.f32 %v1000_v37, %v379_v31  ;;  %v1304_v41 = vmul.f32 %v1000_v37, %v380_v32  ;;  %v1301_v42 = vmul.f32 %v995_v39, %v377_v34  ;;  %v1302_v43 = vmul.f32 %v995_v39, %v378_v38 }
 0x1af   :  { %1588 = vst [vmem:[%s3734_s2 + $0x800] sm:$0xff] %v1323_v35 }
 0x1b0   :  { %1589 = vst.msk [vmem:[%s3734_s2 + $0x808] sm:$0xff] %vm1332_vm0, %v1324_v36 }
 0x1b1   :  { %1568 = vst [vmem:[%s3734_s2 + $0x760] sm:$0xff] %v1303_v40 }
 0x1b2   :  { %1569 = vst.msk [vmem:[%s3734_s2 + $0x768] sm:$0xff] %vm1332_vm0, %v1304_v41 }
 0x1b3   :  { %1566 = vst [vmem:[%s3734_s2 + $0x750] sm:$0xff] %v1301_v42 }
 0x1b4   :  { %1567 = vst.msk [vmem:[%s3734_s2 + $0x758] sm:$0xff] %vm1332_vm0, %v1302_v43  ;;  %v1065_v48 = vpop.permute.xlu2 %1064 }
 0x1b5   :  { %v1329_v50 = vmul.f32 %v1065_v48, %v405_v44  ;;  %v1330_v51 = vmul.f32 %v1065_v48, %v406_v45  ;;  %v1015_v52 = vpop.permute.xlu1 %1014  ;;  %v1010_v54 = vpop.permute.xlu0 %1009 }
 0x1b6   :  { %v1309_v55 = vmul.f32 %v1015_v52, %v385_v46  ;;  %v1310_v56 = vmul.f32 %v1015_v52, %v386_v47  ;;  %v1307_v57 = vmul.f32 %v1010_v54, %v383_v49  ;;  %v1308_v58 = vmul.f32 %v1010_v54, %v384_v53 }
 0x1b7   :  { %1594 = vst [vmem:[%s3734_s2 + $0x830] sm:$0xff] %v1329_v50 }
 0x1b8   :  { %1595 = vst.msk [vmem:[%s3734_s2 + $0x838] sm:$0xff] %vm1332_vm0, %v1330_v51 }
 0x1b9   :  { %1574 = vst [vmem:[%s3734_s2 + $0x790] sm:$0xff] %v1309_v55 }
 0x1ba   :  { %1575 = vst.msk [vmem:[%s3734_s2 + $0x798] sm:$0xff] %vm1332_vm0, %v1310_v56 }
 0x1bb   :  { %1572 = vst [vmem:[%s3734_s2 + $0x780] sm:$0xff] %v1307_v57 }
 0x1bc   :  { %1573 = vst.msk [vmem:[%s3734_s2 + $0x788] sm:$0xff] %vm1332_vm0, %v1308_v58 }
 0x1bd   :  { %v1030_v63 = vpop.permute.xlu1 %1029  ;;  %v1025_v0 = vpop.permute.xlu0 %1024 }
 0x1be   :  { %v1315_v1 = vmul.f32 %v1030_v63, %v391_v59  ;;  %v1316_v2 = vmul.f32 %v1030_v63, %v392_v60  ;;  %v1313_v3 = vmul.f32 %v1025_v0, %v389_v61  ;;  %v1314_v4 = vmul.f32 %v1025_v0, %v390_v62 }
 0x1c0   :  { %1580 = vst [vmem:[%s3734_s2 + $0x7c0] sm:$0xff] %v1315_v1 }
 0x1c1   :  { %1581 = vst.msk [vmem:[%s3734_s2 + $0x7c8] sm:$0xff] %vm1332_vm0, %v1316_v2 }
 0x1c2   :  { %1578 = vst [vmem:[%s3734_s2 + $0x7b0] sm:$0xff] %v1313_v3 }
 0x1c3   :  { %1579 = vst.msk [vmem:[%s3734_s2 + $0x7b8] sm:$0xff] %vm1332_vm0, %v1314_v4 }
 0x1c5   :  { %v1045_v9 = vpop.permute.xlu1 %1044  ;;  %v1040_v10 = vpop.permute.xlu0 %1039 }
 0x1c6   :  { %v1321_v11 = vmul.f32 %v1045_v9, %v397_v5  ;;  %v1322_v12 = vmul.f32 %v1045_v9, %v398_v6  ;;  %v1319_v13 = vmul.f32 %v1040_v10, %v395_v7  ;;  %v1320_v14 = vmul.f32 %v1040_v10, %v396_v8 }
 0x1c8   :  { %1586 = vst [vmem:[%s3734_s2 + $0x7f0] sm:$0xff] %v1321_v11 }
 0x1c9   :  { %1587 = vst.msk [vmem:[%s3734_s2 + $0x7f8] sm:$0xff] %vm1332_vm0, %v1322_v12 }
 0x1ca   :  { %1584 = vst [vmem:[%s3734_s2 + $0x7e0] sm:$0xff] %v1319_v13 }
 0x1cb   :  { %1585 = vst.msk [vmem:[%s3734_s2 + $0x7e8] sm:$0xff] %vm1332_vm0, %v1320_v14 }
 0x1cd   :  { %v1060_v19 = vpop.permute.xlu1 %1059  ;;  %v1055_v20 = vpop.permute.xlu0 %1054 }
 0x1ce   :  { %v1327_v21 = vmul.f32 %v1060_v19, %v403_v15  ;;  %v1328_v22 = vmul.f32 %v1060_v19, %v404_v16  ;;  %v1325_v23 = vmul.f32 %v1055_v20, %v401_v17  ;;  %v1326_v24 = vmul.f32 %v1055_v20, %v402_v18 }
 0x1d0   :  { %1592 = vst [vmem:[%s3734_s2 + $0x820] sm:$0xff] %v1327_v21 }
 0x1d1   :  { %1593 = vst.msk [vmem:[%s3734_s2 + $0x828] sm:$0xff] %vm1332_vm0, %v1328_v22 }
 0x1d2   :  { %1590 = vst [vmem:[%s3734_s2 + $0x810] sm:$0xff] %v1325_v23 }
 0x1d3   :  { %1591 = vst.msk [vmem:[%s3734_s2 + $0x818] sm:$0xff] %vm1332_vm0, %v1326_v24 }

</bundles_post_ra>
